<compile_context>
chip_gen: v7x
topology: tpu7x:2x2x1
jax: 0.10.0
libtpu: 0.0.40
codegen_flags: <defaults>
</compile_context>

<pallas_src>
import functools
import math

import jax
import jax.numpy as jnp
from jax.experimental import pallas as pl
from jax.experimental.pallas import tpu as pltpu

D_MODEL = 32
NHEAD = 4
HEAD_DIM = D_MODEL // NHEAD
DFF = 128
NUM_LAYERS = 2
LN_EPS = 1e-5

_PARAM_ORDER = (
    "in_wT", "in_b", "out_wT", "out_b",
    "ln1_w", "ln1_b",
    "lin1_wT", "lin1_b", "lin2_wT", "lin2_b",
    "ln2_w", "ln2_b",
)


# ----------------------------------------------------------------------------- kernel
def _fused_transformer_kernel(
    ids_ref,          # (R, 1) int32        -- batch-major merchant ids for this tile
    emb_ref,          # (M_pad, D)          -- embedding table (zero padded rows)
    in_wT_ref,        # (L, D, 3D)
    in_b_ref,         # (L, 1, 3D)
    out_wT_ref,       # (L, D, D)
    out_b_ref,        # (L, 1, D)
    ln1_w_ref,        # (L, 1, D)
    ln1_b_ref,        # (L, 1, D)
    lin1_wT_ref,      # (L, D, DFF)
    lin1_b_ref,       # (L, 1, DFF)
    lin2_wT_ref,      # (L, DFF, D)
    lin2_b_ref,       # (L, 1, D)
    ln2_w_ref,        # (L, 1, D)
    ln2_b_ref,        # (L, 1, D)
    o_ref,            # (R, D)              -- rows batch-major: row = b_local*S + s
    attn_sc,          # VMEM (R, D) f32     -- per-head attention outputs land here
    *,
    seq_len,
):
    R, D = o_ref.shape
    S = seq_len
    Bt = R // S
    L = in_wT_ref.shape[0]
    M_pad = emb_ref.shape[0]
    scale = 1.0 / math.sqrt(HEAD_DIM)

    # ---- vectorized embedding gather: one-hot matmul on the MXU ------------------
    ids = ids_ref[...]                                              # (R, 1) int32
    merchant_iota = jax.lax.broadcasted_iota(jnp.int32, (R, M_pad), 1)
    one_hot = (merchant_iota == ids).astype(jnp.float32)            # (R, M_pad)
    x = jnp.dot(one_hot, emb_ref[...],
                preferred_element_type=jnp.float32)                 # (R, D)

    def layer_norm(t, w, b):
        mu = jnp.mean(t, axis=-1, keepdims=True)
        var = jnp.mean((t - mu) ** 2, axis=-1, keepdims=True)
        return (t - mu) * jax.lax.rsqrt(var + LN_EPS) * w + b

    for li in range(L):                                             # both layers fused
        # ---- QKV projection on the whole row block -------------------------------
        qkv = jnp.dot(x, in_wT_ref[li], preferred_element_type=jnp.float32) \
            + in_b_ref[li]                                          # (R, 3D)
        q = qkv[:, :D_MODEL] * scale
        k = qkv[:, D_MODEL:2 * D_MODEL]
        v = qkv[:, 2 * D_MODEL:]

        # ---- multi-head self-attention: batched over the batch tile per head ----
        for h in range(NHEAD):                                      # NHEAD=4, static
            cols = slice(h * HEAD_DIM, (h + 1) * HEAD_DIM)
            qh = q[:, cols].reshape(Bt, S, HEAD_DIM)
            kh = k[:, cols].reshape(Bt, S, HEAD_DIM)
            vh = v[:, cols].reshape(Bt, S, HEAD_DIM)
            sc = jnp.einsum("bqd,bkd->bqk", qh, kh,
                            preferred_element_type=jnp.float32)     # (Bt, S, S)
            sc = sc - jnp.max(sc, axis=-1, keepdims=True)
            p = jnp.exp(sc)
            p = p * pl.reciprocal(jnp.sum(p, axis=-1, keepdims=True), approx=True)
            oh = jnp.einsum("bqk,bkd->bqd", p, vh,
                            preferred_element_type=jnp.float32)     # (Bt, S, HD)
            attn_sc[:, cols] = oh.reshape(R, HEAD_DIM)

        # single out-projection over all rows / all heads
        attn = jnp.dot(attn_sc[...], out_wT_ref[li],
                       preferred_element_type=jnp.float32) + out_b_ref[li]

        # TODO(synk): dropout (p=0.1) is identity here (eval-mode forward semantics).
        # ---- residual + LayerNorm 1 ----------------------------------------------
        x = layer_norm(x + attn, ln1_w_ref[li], ln1_b_ref[li])

        # ---- feed-forward ----------------------------------------------------------
        h1 = jnp.dot(x, lin1_wT_ref[li], preferred_element_type=jnp.float32) \
            + lin1_b_ref[li]                                        # (R, DFF)
        h1 = jnp.maximum(h1, 0.0)                                   # ReLU
        h2 = jnp.dot(h1, lin2_wT_ref[li], preferred_element_type=jnp.float32) \
            + lin2_b_ref[li]                                        # (R, D)

        # ---- residual + LayerNorm 2 ----------------------------------------------
        x = layer_norm(x + h2, ln2_w_ref[li], ln2_b_ref[li])

    # TODO(synk): lane-dense (R*D/128, 128) output packing deferred (needs 32->128
    # lane relayout); at D=32 this store is masked but tiny relative to the matmuls.
    o_ref[...] = x.astype(o_ref.dtype)


# ----------------------------------------------------------------------------- wrapper
def shopping_transformer(src, emb_table, layer_params):
    """src: (S, N) int32 merchant ids (PyTorch batch_first=False). -> (S, N, D)."""
    S, N = src.shape
    M, D = emb_table.shape

    # stack per-layer weights on a leading layer axis -> 12 kernel inputs total
    stacked = [jnp.stack([p[k] for p in layer_params], axis=0) for k in _PARAM_ORDER]

    # embedding table stays 2-D; pad merchant axis to a sublane multiple (zeros).
    m_pad = ((M + 7) // 8) * 8
    emb_pad = jnp.zeros((m_pad, D), jnp.float32).at[:M].set(emb_table.astype(jnp.float32))

    # ---- batch tiling: <=512 rows per grid step, >=2 (even) steps when N > 1 -----
    rows_cap = 512
    bt_cap = max(1, rows_cap // S)
    if 1 < N <= bt_cap:
        n_tiles = 2                         # engage both TCs on v7x even for small N
    else:
        n_tiles = -(-N // bt_cap)
        if n_tiles > 1 and n_tiles % 2:
            n_tiles += 1                    # even number of steps
    bt = -(-N // n_tiles)
    while (bt * S) % 8 != 0:                # sublane alignment of the row tile
        bt += 1
    n_pad = n_tiles * bt
    rows = bt * S

    # batch-major ids (pad with id 0; one-hot gather makes OOB reads impossible).
    ids_bm = jnp.zeros((n_pad, S), jnp.int32).at[:N].set(src.T.astype(jnp.int32))
    ids_col = ids_bm.reshape(n_pad * S, 1)

    def full_spec(arr):
        nd = arr.ndim
        return pl.BlockSpec(arr.shape, lambda i, _nd=nd: (0,) * _nd)

    in_specs = ([pl.BlockSpec((rows, 1), lambda i: (i, 0)), full_spec(emb_pad)]
                + [full_spec(w) for w in stacked])
    out_spec = pl.BlockSpec((rows, D), lambda i: (i, 0))

    kernel = functools.partial(_fused_transformer_kernel, seq_len=S)

    out = pl.pallas_call(
        kernel,
        out_shape=jax.ShapeDtypeStruct((n_pad * S, D), jnp.float32),
        grid_spec=pltpu.PrefetchScalarGridSpec(
            num_scalar_prefetch=0,
            grid=(n_tiles,),
            in_specs=in_specs,
            out_specs=out_spec,
            scratch_shapes=[pltpu.VMEM((rows, D), jnp.float32)],
        ),
        compiler_params=pltpu.CompilerParams(
            dimension_semantics=("parallel",)),
    )(ids_col, emb_pad, *stacked)

    # kernel rows are batch-major; drop batch padding, permute back to (S, N, D)
    out = out.reshape(n_pad, S, D)[:N]
    return jnp.transpose(out, (1, 0, 2))


# ----------------------------------------------------------------------------- reference
def _layer_ref(x, p):  # x: (N, S, D) -- independent pure-JAX check
    qkv = x @ p["in_wT"] + p["in_b"]
    q, k, v = jnp.split(qkv, 3, axis=-1)
    N, S, _ = x.shape
    q = q.reshape(N, S, NHEAD, HEAD_DIM).transpose(0, 2, 1, 3)
    k = k.reshape(N, S, NHEAD, HEAD_DIM).transpose(0, 2, 1, 3)
    v = v.reshape(N, S, NHEAD, HEAD_DIM).transpose(0, 2, 1, 3)
    s = jnp.einsum("nhqd,nhkd->nhqk", q, k) / math.sqrt(HEAD_DIM)
    a = jax.nn.softmax(s, axis=-1)
    o = jnp.einsum("nhqk,nhkd->nhqd", a, v).transpose(0, 2, 1, 3).reshape(N, S, D_MODEL)
    o = o @ p["out_wT"] + p["out_b"]

    def ln(t, w, b):
        mu = t.mean(-1, keepdims=True)
        var = ((t - mu) ** 2).mean(-1, keepdims=True)
        return (t - mu) * jax.lax.rsqrt(var + LN_EPS) * w + b

    x = ln(x + o, p["ln1_w"], p["ln1_b"])
    h = jax.nn.relu(x @ p["lin1_wT"] + p["lin1_b"]) @ p["lin2_wT"] + p["lin2_b"]
    return ln(x + h, p["ln2_w"], p["ln2_b"])


def _model_ref(src, emb_table, layer_params):
    x = jnp.transpose(emb_table[src], (1, 0, 2))
    for p in layer_params:
        x = _layer_ref(x, p)
    return jnp.transpose(x, (1, 0, 2))


# ----------------------------------------------------------------------------- params
def init_params(key, num_merchants):
    def nrm(k, shape, scale=0.05):
        return (scale * jax.random.normal(k, shape)).astype(jnp.float32)

    k_emb, k_layers = jax.random.split(key)
    emb_table = nrm(k_emb, (num_merchants, D_MODEL), scale=1.0)

    layer_params = []
    for li in range(NUM_LAYERS):
        kk = jax.random.fold_in(k_layers, li)
        ks = jax.random.split(kk, 6)
        layer_params.append({
            "in_wT":   nrm(ks[0], (D_MODEL, 3 * D_MODEL)),
            "in_b":    nrm(ks[1], (1, 3 * D_MODEL)),
            "out_wT":  nrm(ks[2], (D_MODEL, D_MODEL)),
            "out_b":   jnp.zeros((1, D_MODEL), jnp.float32),
            "ln1_w":   jnp.ones((1, D_MODEL), jnp.float32),
            "ln1_b":   jnp.zeros((1, D_MODEL), jnp.float32),
            "lin1_wT": nrm(ks[3], (D_MODEL, DFF)),
            "lin1_b":  nrm(ks[4], (1, DFF)),
            "lin2_wT": nrm(ks[5], (DFF, D_MODEL)),
            "lin2_b":  jnp.zeros((1, D_MODEL), jnp.float32),
            "ln2_w":   jnp.ones((1, D_MODEL), jnp.float32),
            "ln2_b":   jnp.zeros((1, D_MODEL), jnp.float32),
        })
    return emb_table, layer_params


# ----------------------------------------------------------------------------- main
if __name__ == "__main__":
    NUM_MERCHANTS = 50
    SEQ, BATCH = 8, 2

    root = jax.random.PRNGKey(0)
    k_data, k_params = jax.random.split(root)

    src = jax.random.randint(k_data, (SEQ, BATCH), 0, NUM_MERCHANTS, dtype=jnp.int32)
    emb_table, layer_params = init_params(k_params, NUM_MERCHANTS)

    fwd = jax.jit(shopping_transformer)
    out = jax.block_until_ready(fwd(src, emb_table, layer_params))

    ref = _model_ref(src, emb_table, layer_params)

    assert out.shape == (SEQ, BATCH, D_MODEL), out.shape
    assert bool(jnp.all(jnp.isfinite(out)))
    assert bool(jnp.allclose(out, ref, atol=1e-3, rtol=1e-3)), "mismatch vs JAX reference"

    print("KERNEL_OK")
</pallas_src>

<mosaic_0001>
module attributes {stable_mosaic.version = 11 : i64} {
  func.func @_fused_transformer_kernel(%arg0: i32, %arg1: memref<8x1xi32, #tpu.memory_space<vmem>>, %arg2: memref<56x32xf32, #tpu.memory_space<vmem>>, %arg3: memref<2x32x96xf32, #tpu.memory_space<vmem>>, %arg4: memref<2x1x96xf32, #tpu.memory_space<vmem>>, %arg5: memref<2x32x32xf32, #tpu.memory_space<vmem>>, %arg6: memref<2x1x32xf32, #tpu.memory_space<vmem>>, %arg7: memref<2x1x32xf32, #tpu.memory_space<vmem>>, %arg8: memref<2x1x32xf32, #tpu.memory_space<vmem>>, %arg9: memref<2x32x128xf32, #tpu.memory_space<vmem>>, %arg10: memref<2x1x128xf32, #tpu.memory_space<vmem>>, %arg11: memref<2x128x32xf32, #tpu.memory_space<vmem>>, %arg12: memref<2x1x32xf32, #tpu.memory_space<vmem>>, %arg13: memref<2x1x32xf32, #tpu.memory_space<vmem>>, %arg14: memref<2x1x32xf32, #tpu.memory_space<vmem>>, %arg15: memref<8x32xf32, #tpu.memory_space<vmem>>, %arg16: memref<8x32xf32, #tpu.memory_space<vmem>>) attributes {dimension_semantics = [#tpu.dimension_semantics<parallel>], iteration_bounds = array<i64: 2>, scalar_prefetch = 0 : i64, scratch_operands = 1 : i64, tpu.core_type = #tpu.core_type<tc>, window_params = [{transform_indices = @transform_0, window_bounds = array<i64: 8, 1>}, {pipeline_mode = #tpu.pipeline_mode<synchronous>, transform_indices = @transform_1, window_bounds = array<i64: 56, 32>}, {pipeline_mode = #tpu.pipeline_mode<synchronous>, transform_indices = @transform_2, window_bounds = array<i64: 2, 32, 96>}, {pipeline_mode = #tpu.pipeline_mode<synchronous>, transform_indices = @transform_3, window_bounds = array<i64: 2, 1, 96>}, {pipeline_mode = #tpu.pipeline_mode<synchronous>, transform_indices = @transform_4, window_bounds = array<i64: 2, 32, 32>}, {pipeline_mode = #tpu.pipeline_mode<synchronous>, transform_indices = @transform_5, window_bounds = array<i64: 2, 1, 32>}, {pipeline_mode = #tpu.pipeline_mode<synchronous>, transform_indices = @transform_6, window_bounds = array<i64: 2, 1, 32>}, {pipeline_mode = #tpu.pipeline_mode<synchronous>, transform_indices = @transform_7, window_bounds = array<i64: 2, 1, 32>}, {pipeline_mode = #tpu.pipeline_mode<synchronous>, transform_indices = @transform_8, window_bounds = array<i64: 2, 32, 128>}, {pipeline_mode = #tpu.pipeline_mode<synchronous>, transform_indices = @transform_9, window_bounds = array<i64: 2, 1, 128>}, {pipeline_mode = #tpu.pipeline_mode<synchronous>, transform_indices = @transform_10, window_bounds = array<i64: 2, 128, 32>}, {pipeline_mode = #tpu.pipeline_mode<synchronous>, transform_indices = @transform_11, window_bounds = array<i64: 2, 1, 32>}, {pipeline_mode = #tpu.pipeline_mode<synchronous>, transform_indices = @transform_12, window_bounds = array<i64: 2, 1, 32>}, {pipeline_mode = #tpu.pipeline_mode<synchronous>, transform_indices = @transform_13, window_bounds = array<i64: 2, 1, 32>}, {transform_indices = @transform_14, window_bounds = array<i64: 8, 32>}]} {
    %c0 = arith.constant 0 : index
    %c0_0 = arith.constant 0 : index
    %0 = vector.load %arg1[%c0, %c0_0] : memref<8x1xi32, #tpu.memory_space<vmem>>, vector<8x1xi32>
    %1 = tpu.iota {dimensions = array<i32: 1>} : vector<8x56xi32>
    %2 = vector.broadcast %0 : vector<8x1xi32> to vector<8x56xi32>
    %3 = arith.cmpi eq, %1, %2 : vector<8x56xi32>
    %4 = arith.extui %3 : vector<8x56xi1> to vector<8x56xi32>
    %5 = arith.sitofp %4 : vector<8x56xi32> to vector<8x56xf32>
    %c0_1 = arith.constant 0 : index
    %c0_2 = arith.constant 0 : index
    %6 = vector.load %arg2[%c0_1, %c0_2] : memref<56x32xf32, #tpu.memory_space<vmem>>, vector<56x32xf32>
    %cst = arith.constant dense<0.000000e+00> : vector<8x32xf32>
    %7 = tpu.matmul %5, %6, %cst {dimension_numbers = #tpu.dot_dimension_numbers<[1], [0], [0], [1], [0, 0, 1, 1], [], []>} : vector<8x56xf32>, vector<56x32xf32>, vector<8x32xf32> -> vector<8x32xf32>
    %c0_3 = arith.constant 0 : index
    %c0_4 = arith.constant 0 : index
    %c0_5 = arith.constant 0 : index
    %8 = vector.load %arg3[%c0_3, %c0_4, %c0_5] : memref<2x32x96xf32, #tpu.memory_space<vmem>>, vector<1x32x96xf32>
    %9 = vector.shape_cast %8 : vector<1x32x96xf32> to vector<32x96xf32>
    %cst_6 = arith.constant dense<0.000000e+00> : vector<8x96xf32>
    %10 = tpu.matmul %7, %9, %cst_6 {dimension_numbers = #tpu.dot_dimension_numbers<[1], [0], [0], [1], [0, 0, 1, 1], [], []>} : vector<8x32xf32>, vector<32x96xf32>, vector<8x96xf32> -> vector<8x96xf32>
    %c0_7 = arith.constant 0 : index
    %c0_8 = arith.constant 0 : index
    %c0_9 = arith.constant 0 : index
    %11 = vector.load %arg4[%c0_7, %c0_8, %c0_9] : memref<2x1x96xf32, #tpu.memory_space<vmem>>, vector<1x1x96xf32>
    %12 = vector.shape_cast %11 : vector<1x1x96xf32> to vector<1x96xf32>
    %13 = vector.broadcast %12 : vector<1x96xf32> to vector<8x96xf32>
    %14 = arith.addf %10, %13 : vector<8x96xf32>
    %15 = vector.extract_strided_slice %14 {offsets = [0, 0], sizes = [8, 32], strides = [1, 1]} : vector<8x96xf32> to vector<8x32xf32>
    %cst_10 = arith.constant 0.353553385 : f32
    %16 = vector.broadcast %cst_10 : f32 to vector<8x32xf32>
    %17 = arith.mulf %15, %16 : vector<8x32xf32>
    %18 = vector.extract_strided_slice %14 {offsets = [0, 32], sizes = [8, 32], strides = [1, 1]} : vector<8x96xf32> to vector<8x32xf32>
    %19 = vector.extract_strided_slice %14 {offsets = [0, 64], sizes = [8, 32], strides = [1, 1]} : vector<8x96xf32> to vector<8x32xf32>
    %20 = vector.extract_strided_slice %17 {offsets = [0, 0], sizes = [8, 8], strides = [1, 1]} : vector<8x32xf32> to vector<8x8xf32>
    %21 = vector.shape_cast %20 : vector<8x8xf32> to vector<1x8x8xf32>
    %22 = vector.extract_strided_slice %18 {offsets = [0, 0], sizes = [8, 8], strides = [1, 1]} : vector<8x32xf32> to vector<8x8xf32>
    %23 = vector.shape_cast %22 : vector<8x8xf32> to vector<1x8x8xf32>
    %24 = vector.extract_strided_slice %19 {offsets = [0, 0], sizes = [8, 8], strides = [1, 1]} : vector<8x32xf32> to vector<8x8xf32>
    %25 = vector.shape_cast %24 : vector<8x8xf32> to vector<1x8x8xf32>
    "tpu.trace_start"() <{level = 10 : i32, message = "bqd,bkd->bqk"}> : () -> ()
    %cst_11 = arith.constant dense<0.000000e+00> : vector<1x8x8xf32>
    %26 = tpu.matmul %21, %23, %cst_11 {dimension_numbers = #tpu.dot_dimension_numbers<[2], [2], [1], [1], [0, 0, 0, 1, 1, 1], [0], [0]>} : vector<1x8x8xf32>, vector<1x8x8xf32>, vector<1x8x8xf32> -> vector<1x8x8xf32>
    "tpu.trace_stop"() : () -> ()
    %cst_12 = arith.constant dense<0xFF800000> : vector<1x8xf32>
    %27 = vector.multi_reduction <maximumf>, %26, %cst_12 [2] : vector<1x8x8xf32> to vector<1x8xf32>
    %28 = vector.shape_cast %27 : vector<1x8xf32> to vector<1x8x1xf32>
    %29 = vector.broadcast %28 : vector<1x8x1xf32> to vector<1x8x8xf32>
    %30 = arith.subf %26, %29 : vector<1x8x8xf32>
    %31 = math.exp %30 : vector<1x8x8xf32>
    %cst_13 = arith.constant dense<0.000000e+00> : vector<1x8xf32>
    %32 = vector.multi_reduction <add>, %31, %cst_13 [2] : vector<1x8x8xf32> to vector<1x8xf32>
    %33 = vector.shape_cast %32 : vector<1x8xf32> to vector<1x8x1xf32>
    %34 = tpu.reciprocal %33 {approx = true} : vector<1x8x1xf32> -> vector<1x8x1xf32>
    %35 = vector.broadcast %34 : vector<1x8x1xf32> to vector<1x8x8xf32>
    %36 = arith.mulf %31, %35 : vector<1x8x8xf32>
    "tpu.trace_start"() <{level = 10 : i32, message = "bqk,bkd->bqd"}> : () -> ()
    %cst_14 = arith.constant dense<0.000000e+00> : vector<1x8x8xf32>
    %37 = tpu.matmul %36, %25, %cst_14 {dimension_numbers = #tpu.dot_dimension_numbers<[2], [1], [1], [2], [0, 0, 0, 1, 1, 2], [0], [0]>} : vector<1x8x8xf32>, vector<1x8x8xf32>, vector<1x8x8xf32> -> vector<1x8x8xf32>
    "tpu.trace_stop"() : () -> ()
    %38 = vector.shape_cast %37 : vector<1x8x8xf32> to vector<8x8xf32>
    %c0_15 = arith.constant 0 : index
    %c0_16 = arith.constant 0 : index
    %39 = vector.load %arg16[%c0_15, %c0_16] : memref<8x32xf32, #tpu.memory_space<vmem>>, vector<8x8xf32>
    tpu.vector_store %arg16[%c0_15, %c0_16], %38 {strides = array<i32>} : memref<8x32xf32, #tpu.memory_space<vmem>>, vector<8x8xf32>,
    %40 = vector.extract_strided_slice %17 {offsets = [0, 8], sizes = [8, 8], strides = [1, 1]} : vector<8x32xf32> to vector<8x8xf32>
    %41 = vector.shape_cast %40 : vector<8x8xf32> to vector<1x8x8xf32>
    %42 = vector.extract_strided_slice %18 {offsets = [0, 8], sizes = [8, 8], strides = [1, 1]} : vector<8x32xf32> to vector<8x8xf32>
    %43 = vector.shape_cast %42 : vector<8x8xf32> to vector<1x8x8xf32>
    %44 = vector.extract_strided_slice %19 {offsets = [0, 8], sizes = [8, 8], strides = [1, 1]} : vector<8x32xf32> to vector<8x8xf32>
    %45 = vector.shape_cast %44 : vector<8x8xf32> to vector<1x8x8xf32>
    "tpu.trace_start"() <{level = 10 : i32, message = "bqd,bkd->bqk"}> : () -> ()
    %cst_17 = arith.constant dense<0.000000e+00> : vector<1x8x8xf32>
    %46 = tpu.matmul %41, %43, %cst_17 {dimension_numbers = #tpu.dot_dimension_numbers<[2], [2], [1], [1], [0, 0, 0, 1, 1, 1], [0], [0]>} : vector<1x8x8xf32>, vector<1x8x8xf32>, vector<1x8x8xf32> -> vector<1x8x8xf32>
    "tpu.trace_stop"() : () -> ()
    %cst_18 = arith.constant dense<0xFF800000> : vector<1x8xf32>
    %47 = vector.multi_reduction <maximumf>, %46, %cst_18 [2] : vector<1x8x8xf32> to vector<1x8xf32>
    %48 = vector.shape_cast %47 : vector<1x8xf32> to vector<1x8x1xf32>
    %49 = vector.broadcast %48 : vector<1x8x1xf32> to vector<1x8x8xf32>
    %50 = arith.subf %46, %49 : vector<1x8x8xf32>
    %51 = math.exp %50 : vector<1x8x8xf32>
    %cst_19 = arith.constant dense<0.000000e+00> : vector<1x8xf32>
    %52 = vector.multi_reduction <add>, %51, %cst_19 [2] : vector<1x8x8xf32> to vector<1x8xf32>
    %53 = vector.shape_cast %52 : vector<1x8xf32> to vector<1x8x1xf32>
    %54 = tpu.reciprocal %53 {approx = true} : vector<1x8x1xf32> -> vector<1x8x1xf32>
    %55 = vector.broadcast %54 : vector<1x8x1xf32> to vector<1x8x8xf32>
    %56 = arith.mulf %51, %55 : vector<1x8x8xf32>
    "tpu.trace_start"() <{level = 10 : i32, message = "bqk,bkd->bqd"}> : () -> ()
    %cst_20 = arith.constant dense<0.000000e+00> : vector<1x8x8xf32>
    %57 = tpu.matmul %56, %45, %cst_20 {dimension_numbers = #tpu.dot_dimension_numbers<[2], [1], [1], [2], [0, 0, 0, 1, 1, 2], [0], [0]>} : vector<1x8x8xf32>, vector<1x8x8xf32>, vector<1x8x8xf32> -> vector<1x8x8xf32>
    "tpu.trace_stop"() : () -> ()
    %58 = vector.shape_cast %57 : vector<1x8x8xf32> to vector<8x8xf32>
    %c0_21 = arith.constant 0 : index
    %c8 = arith.constant 8 : index
    %59 = vector.load %arg16[%c0_21, %c8] : memref<8x32xf32, #tpu.memory_space<vmem>>, vector<8x8xf32>
    tpu.vector_store %arg16[%c0_21, %c8], %58 {strides = array<i32>} : memref<8x32xf32, #tpu.memory_space<vmem>>, vector<8x8xf32>,
    %60 = vector.extract_strided_slice %17 {offsets = [0, 16], sizes = [8, 8], strides = [1, 1]} : vector<8x32xf32> to vector<8x8xf32>
    %61 = vector.shape_cast %60 : vector<8x8xf32> to vector<1x8x8xf32>
    %62 = vector.extract_strided_slice %18 {offsets = [0, 16], sizes = [8, 8], strides = [1, 1]} : vector<8x32xf32> to vector<8x8xf32>
    %63 = vector.shape_cast %62 : vector<8x8xf32> to vector<1x8x8xf32>
    %64 = vector.extract_strided_slice %19 {offsets = [0, 16], sizes = [8, 8], strides = [1, 1]} : vector<8x32xf32> to vector<8x8xf32>
    %65 = vector.shape_cast %64 : vector<8x8xf32> to vector<1x8x8xf32>
    "tpu.trace_start"() <{level = 10 : i32, message = "bqd,bkd->bqk"}> : () -> ()
    %cst_22 = arith.constant dense<0.000000e+00> : vector<1x8x8xf32>
    %66 = tpu.matmul %61, %63, %cst_22 {dimension_numbers = #tpu.dot_dimension_numbers<[2], [2], [1], [1], [0, 0, 0, 1, 1, 1], [0], [0]>} : vector<1x8x8xf32>, vector<1x8x8xf32>, vector<1x8x8xf32> -> vector<1x8x8xf32>
    "tpu.trace_stop"() : () -> ()
    %cst_23 = arith.constant dense<0xFF800000> : vector<1x8xf32>
    %67 = vector.multi_reduction <maximumf>, %66, %cst_23 [2] : vector<1x8x8xf32> to vector<1x8xf32>
    %68 = vector.shape_cast %67 : vector<1x8xf32> to vector<1x8x1xf32>
    %69 = vector.broadcast %68 : vector<1x8x1xf32> to vector<1x8x8xf32>
    %70 = arith.subf %66, %69 : vector<1x8x8xf32>
    %71 = math.exp %70 : vector<1x8x8xf32>
    %cst_24 = arith.constant dense<0.000000e+00> : vector<1x8xf32>
    %72 = vector.multi_reduction <add>, %71, %cst_24 [2] : vector<1x8x8xf32> to vector<1x8xf32>
    %73 = vector.shape_cast %72 : vector<1x8xf32> to vector<1x8x1xf32>
    %74 = tpu.reciprocal %73 {approx = true} : vector<1x8x1xf32> -> vector<1x8x1xf32>
    %75 = vector.broadcast %74 : vector<1x8x1xf32> to vector<1x8x8xf32>
    %76 = arith.mulf %71, %75 : vector<1x8x8xf32>
    "tpu.trace_start"() <{level = 10 : i32, message = "bqk,bkd->bqd"}> : () -> ()
    %cst_25 = arith.constant dense<0.000000e+00> : vector<1x8x8xf32>
    %77 = tpu.matmul %76, %65, %cst_25 {dimension_numbers = #tpu.dot_dimension_numbers<[2], [1], [1], [2], [0, 0, 0, 1, 1, 2], [0], [0]>} : vector<1x8x8xf32>, vector<1x8x8xf32>, vector<1x8x8xf32> -> vector<1x8x8xf32>
    "tpu.trace_stop"() : () -> ()
    %78 = vector.shape_cast %77 : vector<1x8x8xf32> to vector<8x8xf32>
    %c0_26 = arith.constant 0 : index
    %c16 = arith.constant 16 : index
    %79 = vector.load %arg16[%c0_26, %c16] : memref<8x32xf32, #tpu.memory_space<vmem>>, vector<8x8xf32>
    tpu.vector_store %arg16[%c0_26, %c16], %78 {strides = array<i32>} : memref<8x32xf32, #tpu.memory_space<vmem>>, vector<8x8xf32>,
    %80 = vector.extract_strided_slice %17 {offsets = [0, 24], sizes = [8, 8], strides = [1, 1]} : vector<8x32xf32> to vector<8x8xf32>
    %81 = vector.shape_cast %80 : vector<8x8xf32> to vector<1x8x8xf32>
    %82 = vector.extract_strided_slice %18 {offsets = [0, 24], sizes = [8, 8], strides = [1, 1]} : vector<8x32xf32> to vector<8x8xf32>
    %83 = vector.shape_cast %82 : vector<8x8xf32> to vector<1x8x8xf32>
    %84 = vector.extract_strided_slice %19 {offsets = [0, 24], sizes = [8, 8], strides = [1, 1]} : vector<8x32xf32> to vector<8x8xf32>
    %85 = vector.shape_cast %84 : vector<8x8xf32> to vector<1x8x8xf32>
    "tpu.trace_start"() <{level = 10 : i32, message = "bqd,bkd->bqk"}> : () -> ()
    %cst_27 = arith.constant dense<0.000000e+00> : vector<1x8x8xf32>
    %86 = tpu.matmul %81, %83, %cst_27 {dimension_numbers = #tpu.dot_dimension_numbers<[2], [2], [1], [1], [0, 0, 0, 1, 1, 1], [0], [0]>} : vector<1x8x8xf32>, vector<1x8x8xf32>, vector<1x8x8xf32> -> vector<1x8x8xf32>
    "tpu.trace_stop"() : () -> ()
    %cst_28 = arith.constant dense<0xFF800000> : vector<1x8xf32>
    %87 = vector.multi_reduction <maximumf>, %86, %cst_28 [2] : vector<1x8x8xf32> to vector<1x8xf32>
    %88 = vector.shape_cast %87 : vector<1x8xf32> to vector<1x8x1xf32>
    %89 = vector.broadcast %88 : vector<1x8x1xf32> to vector<1x8x8xf32>
    %90 = arith.subf %86, %89 : vector<1x8x8xf32>
    %91 = math.exp %90 : vector<1x8x8xf32>
    %cst_29 = arith.constant dense<0.000000e+00> : vector<1x8xf32>
    %92 = vector.multi_reduction <add>, %91, %cst_29 [2] : vector<1x8x8xf32> to vector<1x8xf32>
    %93 = vector.shape_cast %92 : vector<1x8xf32> to vector<1x8x1xf32>
    %94 = tpu.reciprocal %93 {approx = true} : vector<1x8x1xf32> -> vector<1x8x1xf32>
    %95 = vector.broadcast %94 : vector<1x8x1xf32> to vector<1x8x8xf32>
    %96 = arith.mulf %91, %95 : vector<1x8x8xf32>
    "tpu.trace_start"() <{level = 10 : i32, message = "bqk,bkd->bqd"}> : () -> ()
    %cst_30 = arith.constant dense<0.000000e+00> : vector<1x8x8xf32>
    %97 = tpu.matmul %96, %85, %cst_30 {dimension_numbers = #tpu.dot_dimension_numbers<[2], [1], [1], [2], [0, 0, 0, 1, 1, 2], [0], [0]>} : vector<1x8x8xf32>, vector<1x8x8xf32>, vector<1x8x8xf32> -> vector<1x8x8xf32>
    "tpu.trace_stop"() : () -> ()
    %98 = vector.shape_cast %97 : vector<1x8x8xf32> to vector<8x8xf32>
    %c0_31 = arith.constant 0 : index
    %c24 = arith.constant 24 : index
    %99 = vector.load %arg16[%c0_31, %c24] : memref<8x32xf32, #tpu.memory_space<vmem>>, vector<8x8xf32>
    tpu.vector_store %arg16[%c0_31, %c24], %98 {strides = array<i32>} : memref<8x32xf32, #tpu.memory_space<vmem>>, vector<8x8xf32>,
    %c0_32 = arith.constant 0 : index
    %c0_33 = arith.constant 0 : index
    %100 = vector.load %arg16[%c0_32, %c0_33] : memref<8x32xf32, #tpu.memory_space<vmem>>, vector<8x32xf32>
    %c0_34 = arith.constant 0 : index
    %c0_35 = arith.constant 0 : index
    %c0_36 = arith.constant 0 : index
    %101 = vector.load %arg5[%c0_34, %c0_35, %c0_36] : memref<2x32x32xf32, #tpu.memory_space<vmem>>, vector<1x32x32xf32>
    %102 = vector.shape_cast %101 : vector<1x32x32xf32> to vector<32x32xf32>
    %cst_37 = arith.constant dense<0.000000e+00> : vector<8x32xf32>
    %103 = tpu.matmul %100, %102, %cst_37 {dimension_numbers = #tpu.dot_dimension_numbers<[1], [0], [0], [1], [0, 0, 1, 1], [], []>} : vector<8x32xf32>, vector<32x32xf32>, vector<8x32xf32> -> vector<8x32xf32>
    %c0_38 = arith.constant 0 : index
    %c0_39 = arith.constant 0 : index
    %c0_40 = arith.constant 0 : index
    %104 = vector.load %arg6[%c0_38, %c0_39, %c0_40] : memref<2x1x32xf32, #tpu.memory_space<vmem>>, vector<1x1x32xf32>
    %105 = vector.shape_cast %104 : vector<1x1x32xf32> to vector<1x32xf32>
    %106 = vector.broadcast %105 : vector<1x32xf32> to vector<8x32xf32>
    %107 = arith.addf %103, %106 : vector<8x32xf32>
    %108 = arith.addf %7, %107 : vector<8x32xf32>
    %c0_41 = arith.constant 0 : index
    %c0_42 = arith.constant 0 : index
    %c0_43 = arith.constant 0 : index
    %109 = vector.load %arg7[%c0_41, %c0_42, %c0_43] : memref<2x1x32xf32, #tpu.memory_space<vmem>>, vector<1x1x32xf32>
    %110 = vector.shape_cast %109 : vector<1x1x32xf32> to vector<1x32xf32>
    %c0_44 = arith.constant 0 : index
    %c0_45 = arith.constant 0 : index
    %c0_46 = arith.constant 0 : index
    %111 = vector.load %arg8[%c0_44, %c0_45, %c0_46] : memref<2x1x32xf32, #tpu.memory_space<vmem>>, vector<1x1x32xf32>
    %112 = vector.shape_cast %111 : vector<1x1x32xf32> to vector<1x32xf32>
    %cst_47 = arith.constant dense<0.000000e+00> : vector<8xf32>
    %113 = vector.multi_reduction <add>, %108, %cst_47 [1] : vector<8x32xf32> to vector<8xf32>
    %114 = vector.shape_cast %113 : vector<8xf32> to vector<8x1xf32>
    %cst_48 = arith.constant 3.200000e+01 : f32
    %115 = vector.broadcast %cst_48 : f32 to vector<8x1xf32>
    %116 = arith.divf %114, %115 : vector<8x1xf32>
    %117 = vector.broadcast %116 : vector<8x1xf32> to vector<8x32xf32>
    %118 = arith.subf %108, %117 : vector<8x32xf32>
    %119 = arith.mulf %118, %118 : vector<8x32xf32>
    %cst_49 = arith.constant dense<0.000000e+00> : vector<8xf32>
    %120 = vector.multi_reduction <add>, %119, %cst_49 [1] : vector<8x32xf32> to vector<8xf32>
    %121 = vector.shape_cast %120 : vector<8xf32> to vector<8x1xf32>
    %cst_50 = arith.constant 3.200000e+01 : f32
    %122 = vector.broadcast %cst_50 : f32 to vector<8x1xf32>
    %123 = arith.divf %121, %122 : vector<8x1xf32>
    %124 = vector.broadcast %116 : vector<8x1xf32> to vector<8x32xf32>
    %125 = arith.subf %108, %124 : vector<8x32xf32>
    %cst_51 = arith.constant 9.99999974E-6 : f32
    %126 = vector.broadcast %cst_51 : f32 to vector<8x1xf32>
    %127 = arith.addf %123, %126 : vector<8x1xf32>
    %128 = math.rsqrt %127 : vector<8x1xf32>
    %129 = vector.broadcast %128 : vector<8x1xf32> to vector<8x32xf32>
    %130 = arith.mulf %125, %129 : vector<8x32xf32>
    %131 = vector.broadcast %110 : vector<1x32xf32> to vector<8x32xf32>
    %132 = arith.mulf %130, %131 : vector<8x32xf32>
    %133 = vector.broadcast %112 : vector<1x32xf32> to vector<8x32xf32>
    %134 = arith.addf %132, %133 : vector<8x32xf32>
    %c0_52 = arith.constant 0 : index
    %c0_53 = arith.constant 0 : index
    %c0_54 = arith.constant 0 : index
    %135 = vector.load %arg9[%c0_52, %c0_53, %c0_54] : memref<2x32x128xf32, #tpu.memory_space<vmem>>, vector<1x32x128xf32>
    %136 = vector.shape_cast %135 : vector<1x32x128xf32> to vector<32x128xf32>
    %cst_55 = arith.constant dense<0.000000e+00> : vector<8x128xf32>
    %137 = tpu.matmul %134, %136, %cst_55 {dimension_numbers = #tpu.dot_dimension_numbers<[1], [0], [0], [1], [0, 0, 1, 1], [], []>} : vector<8x32xf32>, vector<32x128xf32>, vector<8x128xf32> -> vector<8x128xf32>
    %c0_56 = arith.constant 0 : index
    %c0_57 = arith.constant 0 : index
    %c0_58 = arith.constant 0 : index
    %138 = vector.load %arg10[%c0_56, %c0_57, %c0_58] : memref<2x1x128xf32, #tpu.memory_space<vmem>>, vector<1x1x128xf32>
    %139 = vector.shape_cast %138 : vector<1x1x128xf32> to vector<1x128xf32>
    %140 = vector.broadcast %139 : vector<1x128xf32> to vector<8x128xf32>
    %141 = arith.addf %137, %140 : vector<8x128xf32>
    %cst_59 = arith.constant 0.000000e+00 : f32
    %142 = vector.broadcast %cst_59 : f32 to vector<8x128xf32>
    %143 = arith.maximumf %141, %142 : vector<8x128xf32>
    %c0_60 = arith.constant 0 : index
    %c0_61 = arith.constant 0 : index
    %c0_62 = arith.constant 0 : index
    %144 = vector.load %arg11[%c0_60, %c0_61, %c0_62] : memref<2x128x32xf32, #tpu.memory_space<vmem>>, vector<1x128x32xf32>
    %145 = vector.shape_cast %144 : vector<1x128x32xf32> to vector<128x32xf32>
    %cst_63 = arith.constant dense<0.000000e+00> : vector<8x32xf32>
    %146 = tpu.matmul %143, %145, %cst_63 {dimension_numbers = #tpu.dot_dimension_numbers<[1], [0], [0], [1], [0, 0, 1, 1], [], []>} : vector<8x128xf32>, vector<128x32xf32>, vector<8x32xf32> -> vector<8x32xf32>
    %c0_64 = arith.constant 0 : index
    %c0_65 = arith.constant 0 : index
    %c0_66 = arith.constant 0 : index
    %147 = vector.load %arg12[%c0_64, %c0_65, %c0_66] : memref<2x1x32xf32, #tpu.memory_space<vmem>>, vector<1x1x32xf32>
    %148 = vector.shape_cast %147 : vector<1x1x32xf32> to vector<1x32xf32>
    %149 = vector.broadcast %148 : vector<1x32xf32> to vector<8x32xf32>
    %150 = arith.addf %146, %149 : vector<8x32xf32>
    %151 = arith.addf %134, %150 : vector<8x32xf32>
    %c0_67 = arith.constant 0 : index
    %c0_68 = arith.constant 0 : index
    %c0_69 = arith.constant 0 : index
    %152 = vector.load %arg13[%c0_67, %c0_68, %c0_69] : memref<2x1x32xf32, #tpu.memory_space<vmem>>, vector<1x1x32xf32>
    %153 = vector.shape_cast %152 : vector<1x1x32xf32> to vector<1x32xf32>
    %c0_70 = arith.constant 0 : index
    %c0_71 = arith.constant 0 : index
    %c0_72 = arith.constant 0 : index
    %154 = vector.load %arg14[%c0_70, %c0_71, %c0_72] : memref<2x1x32xf32, #tpu.memory_space<vmem>>, vector<1x1x32xf32>
    %155 = vector.shape_cast %154 : vector<1x1x32xf32> to vector<1x32xf32>
    %cst_73 = arith.constant dense<0.000000e+00> : vector<8xf32>
    %156 = vector.multi_reduction <add>, %151, %cst_73 [1] : vector<8x32xf32> to vector<8xf32>
    %157 = vector.shape_cast %156 : vector<8xf32> to vector<8x1xf32>
    %cst_74 = arith.constant 3.200000e+01 : f32
    %158 = vector.broadcast %cst_74 : f32 to vector<8x1xf32>
    %159 = arith.divf %157, %158 : vector<8x1xf32>
    %160 = vector.broadcast %159 : vector<8x1xf32> to vector<8x32xf32>
    %161 = arith.subf %151, %160 : vector<8x32xf32>
    %162 = arith.mulf %161, %161 : vector<8x32xf32>
    %cst_75 = arith.constant dense<0.000000e+00> : vector<8xf32>
    %163 = vector.multi_reduction <add>, %162, %cst_75 [1] : vector<8x32xf32> to vector<8xf32>
    %164 = vector.shape_cast %163 : vector<8xf32> to vector<8x1xf32>
    %cst_76 = arith.constant 3.200000e+01 : f32
    %165 = vector.broadcast %cst_76 : f32 to vector<8x1xf32>
    %166 = arith.divf %164, %165 : vector<8x1xf32>
    %167 = vector.broadcast %159 : vector<8x1xf32> to vector<8x32xf32>
    %168 = arith.subf %151, %167 : vector<8x32xf32>
    %cst_77 = arith.constant 9.99999974E-6 : f32
    %169 = vector.broadcast %cst_77 : f32 to vector<8x1xf32>
    %170 = arith.addf %166, %169 : vector<8x1xf32>
    %171 = math.rsqrt %170 : vector<8x1xf32>
    %172 = vector.broadcast %171 : vector<8x1xf32> to vector<8x32xf32>
    %173 = arith.mulf %168, %172 : vector<8x32xf32>
    %174 = vector.broadcast %153 : vector<1x32xf32> to vector<8x32xf32>
    %175 = arith.mulf %173, %174 : vector<8x32xf32>
    %176 = vector.broadcast %155 : vector<1x32xf32> to vector<8x32xf32>
    %177 = arith.addf %175, %176 : vector<8x32xf32>
    %c1 = arith.constant 1 : index
    %c0_78 = arith.constant 0 : index
    %c0_79 = arith.constant 0 : index
    %178 = vector.load %arg3[%c1, %c0_78, %c0_79] : memref<2x32x96xf32, #tpu.memory_space<vmem>>, vector<1x32x96xf32>
    %179 = vector.shape_cast %178 : vector<1x32x96xf32> to vector<32x96xf32>
    %cst_80 = arith.constant dense<0.000000e+00> : vector<8x96xf32>
    %180 = tpu.matmul %177, %179, %cst_80 {dimension_numbers = #tpu.dot_dimension_numbers<[1], [0], [0], [1], [0, 0, 1, 1], [], []>} : vector<8x32xf32>, vector<32x96xf32>, vector<8x96xf32> -> vector<8x96xf32>
    %c1_81 = arith.constant 1 : index
    %c0_82 = arith.constant 0 : index
    %c0_83 = arith.constant 0 : index
    %181 = vector.load %arg4[%c1_81, %c0_82, %c0_83] : memref<2x1x96xf32, #tpu.memory_space<vmem>>, vector<1x1x96xf32>
    %182 = vector.shape_cast %181 : vector<1x1x96xf32> to vector<1x96xf32>
    %183 = vector.broadcast %182 : vector<1x96xf32> to vector<8x96xf32>
    %184 = arith.addf %180, %183 : vector<8x96xf32>
    %185 = vector.extract_strided_slice %184 {offsets = [0, 0], sizes = [8, 32], strides = [1, 1]} : vector<8x96xf32> to vector<8x32xf32>
    %cst_84 = arith.constant 0.353553385 : f32
    %186 = vector.broadcast %cst_84 : f32 to vector<8x32xf32>
    %187 = arith.mulf %185, %186 : vector<8x32xf32>
    %188 = vector.extract_strided_slice %184 {offsets = [0, 32], sizes = [8, 32], strides = [1, 1]} : vector<8x96xf32> to vector<8x32xf32>
    %189 = vector.extract_strided_slice %184 {offsets = [0, 64], sizes = [8, 32], strides = [1, 1]} : vector<8x96xf32> to vector<8x32xf32>
    %190 = vector.extract_strided_slice %187 {offsets = [0, 0], sizes = [8, 8], strides = [1, 1]} : vector<8x32xf32> to vector<8x8xf32>
    %191 = vector.shape_cast %190 : vector<8x8xf32> to vector<1x8x8xf32>
    %192 = vector.extract_strided_slice %188 {offsets = [0, 0], sizes = [8, 8], strides = [1, 1]} : vector<8x32xf32> to vector<8x8xf32>
    %193 = vector.shape_cast %192 : vector<8x8xf32> to vector<1x8x8xf32>
    %194 = vector.extract_strided_slice %189 {offsets = [0, 0], sizes = [8, 8], strides = [1, 1]} : vector<8x32xf32> to vector<8x8xf32>
    %195 = vector.shape_cast %194 : vector<8x8xf32> to vector<1x8x8xf32>
    "tpu.trace_start"() <{level = 10 : i32, message = "bqd,bkd->bqk"}> : () -> ()
    %cst_85 = arith.constant dense<0.000000e+00> : vector<1x8x8xf32>
    %196 = tpu.matmul %191, %193, %cst_85 {dimension_numbers = #tpu.dot_dimension_numbers<[2], [2], [1], [1], [0, 0, 0, 1, 1, 1], [0], [0]>} : vector<1x8x8xf32>, vector<1x8x8xf32>, vector<1x8x8xf32> -> vector<1x8x8xf32>
    "tpu.trace_stop"() : () -> ()
    %cst_86 = arith.constant dense<0xFF800000> : vector<1x8xf32>
    %197 = vector.multi_reduction <maximumf>, %196, %cst_86 [2] : vector<1x8x8xf32> to vector<1x8xf32>
    %198 = vector.shape_cast %197 : vector<1x8xf32> to vector<1x8x1xf32>
    %199 = vector.broadcast %198 : vector<1x8x1xf32> to vector<1x8x8xf32>
    %200 = arith.subf %196, %199 : vector<1x8x8xf32>
    %201 = math.exp %200 : vector<1x8x8xf32>
    %cst_87 = arith.constant dense<0.000000e+00> : vector<1x8xf32>
    %202 = vector.multi_reduction <add>, %201, %cst_87 [2] : vector<1x8x8xf32> to vector<1x8xf32>
    %203 = vector.shape_cast %202 : vector<1x8xf32> to vector<1x8x1xf32>
    %204 = tpu.reciprocal %203 {approx = true} : vector<1x8x1xf32> -> vector<1x8x1xf32>
    %205 = vector.broadcast %204 : vector<1x8x1xf32> to vector<1x8x8xf32>
    %206 = arith.mulf %201, %205 : vector<1x8x8xf32>
    "tpu.trace_start"() <{level = 10 : i32, message = "bqk,bkd->bqd"}> : () -> ()
    %cst_88 = arith.constant dense<0.000000e+00> : vector<1x8x8xf32>
    %207 = tpu.matmul %206, %195, %cst_88 {dimension_numbers = #tpu.dot_dimension_numbers<[2], [1], [1], [2], [0, 0, 0, 1, 1, 2], [0], [0]>} : vector<1x8x8xf32>, vector<1x8x8xf32>, vector<1x8x8xf32> -> vector<1x8x8xf32>
    "tpu.trace_stop"() : () -> ()
    %208 = vector.shape_cast %207 : vector<1x8x8xf32> to vector<8x8xf32>
    %c0_89 = arith.constant 0 : index
    %c0_90 = arith.constant 0 : index
    %209 = vector.load %arg16[%c0_89, %c0_90] : memref<8x32xf32, #tpu.memory_space<vmem>>, vector<8x8xf32>
    tpu.vector_store %arg16[%c0_89, %c0_90], %208 {strides = array<i32>} : memref<8x32xf32, #tpu.memory_space<vmem>>, vector<8x8xf32>,
    %210 = vector.extract_strided_slice %187 {offsets = [0, 8], sizes = [8, 8], strides = [1, 1]} : vector<8x32xf32> to vector<8x8xf32>
    %211 = vector.shape_cast %210 : vector<8x8xf32> to vector<1x8x8xf32>
    %212 = vector.extract_strided_slice %188 {offsets = [0, 8], sizes = [8, 8], strides = [1, 1]} : vector<8x32xf32> to vector<8x8xf32>
    %213 = vector.shape_cast %212 : vector<8x8xf32> to vector<1x8x8xf32>
    %214 = vector.extract_strided_slice %189 {offsets = [0, 8], sizes = [8, 8], strides = [1, 1]} : vector<8x32xf32> to vector<8x8xf32>
    %215 = vector.shape_cast %214 : vector<8x8xf32> to vector<1x8x8xf32>
    "tpu.trace_start"() <{level = 10 : i32, message = "bqd,bkd->bqk"}> : () -> ()
    %cst_91 = arith.constant dense<0.000000e+00> : vector<1x8x8xf32>
    %216 = tpu.matmul %211, %213, %cst_91 {dimension_numbers = #tpu.dot_dimension_numbers<[2], [2], [1], [1], [0, 0, 0, 1, 1, 1], [0], [0]>} : vector<1x8x8xf32>, vector<1x8x8xf32>, vector<1x8x8xf32> -> vector<1x8x8xf32>
    "tpu.trace_stop"() : () -> ()
    %cst_92 = arith.constant dense<0xFF800000> : vector<1x8xf32>
    %217 = vector.multi_reduction <maximumf>, %216, %cst_92 [2] : vector<1x8x8xf32> to vector<1x8xf32>
    %218 = vector.shape_cast %217 : vector<1x8xf32> to vector<1x8x1xf32>
    %219 = vector.broadcast %218 : vector<1x8x1xf32> to vector<1x8x8xf32>
    %220 = arith.subf %216, %219 : vector<1x8x8xf32>
    %221 = math.exp %220 : vector<1x8x8xf32>
    %cst_93 = arith.constant dense<0.000000e+00> : vector<1x8xf32>
    %222 = vector.multi_reduction <add>, %221, %cst_93 [2] : vector<1x8x8xf32> to vector<1x8xf32>
    %223 = vector.shape_cast %222 : vector<1x8xf32> to vector<1x8x1xf32>
    %224 = tpu.reciprocal %223 {approx = true} : vector<1x8x1xf32> -> vector<1x8x1xf32>
    %225 = vector.broadcast %224 : vector<1x8x1xf32> to vector<1x8x8xf32>
    %226 = arith.mulf %221, %225 : vector<1x8x8xf32>
    "tpu.trace_start"() <{level = 10 : i32, message = "bqk,bkd->bqd"}> : () -> ()
    %cst_94 = arith.constant dense<0.000000e+00> : vector<1x8x8xf32>
    %227 = tpu.matmul %226, %215, %cst_94 {dimension_numbers = #tpu.dot_dimension_numbers<[2], [1], [1], [2], [0, 0, 0, 1, 1, 2], [0], [0]>} : vector<1x8x8xf32>, vector<1x8x8xf32>, vector<1x8x8xf32> -> vector<1x8x8xf32>
    "tpu.trace_stop"() : () -> ()
    %228 = vector.shape_cast %227 : vector<1x8x8xf32> to vector<8x8xf32>
    %c0_95 = arith.constant 0 : index
    %c8_96 = arith.constant 8 : index
    %229 = vector.load %arg16[%c0_95, %c8_96] : memref<8x32xf32, #tpu.memory_space<vmem>>, vector<8x8xf32>
    tpu.vector_store %arg16[%c0_95, %c8_96], %228 {strides = array<i32>} : memref<8x32xf32, #tpu.memory_space<vmem>>, vector<8x8xf32>,
    %230 = vector.extract_strided_slice %187 {offsets = [0, 16], sizes = [8, 8], strides = [1, 1]} : vector<8x32xf32> to vector<8x8xf32>
    %231 = vector.shape_cast %230 : vector<8x8xf32> to vector<1x8x8xf32>
    %232 = vector.extract_strided_slice %188 {offsets = [0, 16], sizes = [8, 8], strides = [1, 1]} : vector<8x32xf32> to vector<8x8xf32>
    %233 = vector.shape_cast %232 : vector<8x8xf32> to vector<1x8x8xf32>
    %234 = vector.extract_strided_slice %189 {offsets = [0, 16], sizes = [8, 8], strides = [1, 1]} : vector<8x32xf32> to vector<8x8xf32>
    %235 = vector.shape_cast %234 : vector<8x8xf32> to vector<1x8x8xf32>
    "tpu.trace_start"() <{level = 10 : i32, message = "bqd,bkd->bqk"}> : () -> ()
    %cst_97 = arith.constant dense<0.000000e+00> : vector<1x8x8xf32>
    %236 = tpu.matmul %231, %233, %cst_97 {dimension_numbers = #tpu.dot_dimension_numbers<[2], [2], [1], [1], [0, 0, 0, 1, 1, 1], [0], [0]>} : vector<1x8x8xf32>, vector<1x8x8xf32>, vector<1x8x8xf32> -> vector<1x8x8xf32>
    "tpu.trace_stop"() : () -> ()
    %cst_98 = arith.constant dense<0xFF800000> : vector<1x8xf32>
    %237 = vector.multi_reduction <maximumf>, %236, %cst_98 [2] : vector<1x8x8xf32> to vector<1x8xf32>
    %238 = vector.shape_cast %237 : vector<1x8xf32> to vector<1x8x1xf32>
    %239 = vector.broadcast %238 : vector<1x8x1xf32> to vector<1x8x8xf32>
    %240 = arith.subf %236, %239 : vector<1x8x8xf32>
    %241 = math.exp %240 : vector<1x8x8xf32>
    %cst_99 = arith.constant dense<0.000000e+00> : vector<1x8xf32>
    %242 = vector.multi_reduction <add>, %241, %cst_99 [2] : vector<1x8x8xf32> to vector<1x8xf32>
    %243 = vector.shape_cast %242 : vector<1x8xf32> to vector<1x8x1xf32>
    %244 = tpu.reciprocal %243 {approx = true} : vector<1x8x1xf32> -> vector<1x8x1xf32>
    %245 = vector.broadcast %244 : vector<1x8x1xf32> to vector<1x8x8xf32>
    %246 = arith.mulf %241, %245 : vector<1x8x8xf32>
    "tpu.trace_start"() <{level = 10 : i32, message = "bqk,bkd->bqd"}> : () -> ()
    %cst_100 = arith.constant dense<0.000000e+00> : vector<1x8x8xf32>
    %247 = tpu.matmul %246, %235, %cst_100 {dimension_numbers = #tpu.dot_dimension_numbers<[2], [1], [1], [2], [0, 0, 0, 1, 1, 2], [0], [0]>} : vector<1x8x8xf32>, vector<1x8x8xf32>, vector<1x8x8xf32> -> vector<1x8x8xf32>
    "tpu.trace_stop"() : () -> ()
    %248 = vector.shape_cast %247 : vector<1x8x8xf32> to vector<8x8xf32>
    %c0_101 = arith.constant 0 : index
    %c16_102 = arith.constant 16 : index
    %249 = vector.load %arg16[%c0_101, %c16_102] : memref<8x32xf32, #tpu.memory_space<vmem>>, vector<8x8xf32>
    tpu.vector_store %arg16[%c0_101, %c16_102], %248 {strides = array<i32>} : memref<8x32xf32, #tpu.memory_space<vmem>>, vector<8x8xf32>,
    %250 = vector.extract_strided_slice %187 {offsets = [0, 24], sizes = [8, 8], strides = [1, 1]} : vector<8x32xf32> to vector<8x8xf32>
    %251 = vector.shape_cast %250 : vector<8x8xf32> to vector<1x8x8xf32>
    %252 = vector.extract_strided_slice %188 {offsets = [0, 24], sizes = [8, 8], strides = [1, 1]} : vector<8x32xf32> to vector<8x8xf32>
    %253 = vector.shape_cast %252 : vector<8x8xf32> to vector<1x8x8xf32>
    %254 = vector.extract_strided_slice %189 {offsets = [0, 24], sizes = [8, 8], strides = [1, 1]} : vector<8x32xf32> to vector<8x8xf32>
    %255 = vector.shape_cast %254 : vector<8x8xf32> to vector<1x8x8xf32>
    "tpu.trace_start"() <{level = 10 : i32, message = "bqd,bkd->bqk"}> : () -> ()
    %cst_103 = arith.constant dense<0.000000e+00> : vector<1x8x8xf32>
    %256 = tpu.matmul %251, %253, %cst_103 {dimension_numbers = #tpu.dot_dimension_numbers<[2], [2], [1], [1], [0, 0, 0, 1, 1, 1], [0], [0]>} : vector<1x8x8xf32>, vector<1x8x8xf32>, vector<1x8x8xf32> -> vector<1x8x8xf32>
    "tpu.trace_stop"() : () -> ()
    %cst_104 = arith.constant dense<0xFF800000> : vector<1x8xf32>
    %257 = vector.multi_reduction <maximumf>, %256, %cst_104 [2] : vector<1x8x8xf32> to vector<1x8xf32>
    %258 = vector.shape_cast %257 : vector<1x8xf32> to vector<1x8x1xf32>
    %259 = vector.broadcast %258 : vector<1x8x1xf32> to vector<1x8x8xf32>
    %260 = arith.subf %256, %259 : vector<1x8x8xf32>
    %261 = math.exp %260 : vector<1x8x8xf32>
    %cst_105 = arith.constant dense<0.000000e+00> : vector<1x8xf32>
    %262 = vector.multi_reduction <add>, %261, %cst_105 [2] : vector<1x8x8xf32> to vector<1x8xf32>
    %263 = vector.shape_cast %262 : vector<1x8xf32> to vector<1x8x1xf32>
    %264 = tpu.reciprocal %263 {approx = true} : vector<1x8x1xf32> -> vector<1x8x1xf32>
    %265 = vector.broadcast %264 : vector<1x8x1xf32> to vector<1x8x8xf32>
    %266 = arith.mulf %261, %265 : vector<1x8x8xf32>
    "tpu.trace_start"() <{level = 10 : i32, message = "bqk,bkd->bqd"}> : () -> ()
    %cst_106 = arith.constant dense<0.000000e+00> : vector<1x8x8xf32>
    %267 = tpu.matmul %266, %255, %cst_106 {dimension_numbers = #tpu.dot_dimension_numbers<[2], [1], [1], [2], [0, 0, 0, 1, 1, 2], [0], [0]>} : vector<1x8x8xf32>, vector<1x8x8xf32>, vector<1x8x8xf32> -> vector<1x8x8xf32>
    "tpu.trace_stop"() : () -> ()
    %268 = vector.shape_cast %267 : vector<1x8x8xf32> to vector<8x8xf32>
    %c0_107 = arith.constant 0 : index
    %c24_108 = arith.constant 24 : index
    %269 = vector.load %arg16[%c0_107, %c24_108] : memref<8x32xf32, #tpu.memory_space<vmem>>, vector<8x8xf32>
    tpu.vector_store %arg16[%c0_107, %c24_108], %268 {strides = array<i32>} : memref<8x32xf32, #tpu.memory_space<vmem>>, vector<8x8xf32>,
    %c0_109 = arith.constant 0 : index
    %c0_110 = arith.constant 0 : index
    %270 = vector.load %arg16[%c0_109, %c0_110] : memref<8x32xf32, #tpu.memory_space<vmem>>, vector<8x32xf32>
    %c1_111 = arith.constant 1 : index
    %c0_112 = arith.constant 0 : index
    %c0_113 = arith.constant 0 : index
    %271 = vector.load %arg5[%c1_111, %c0_112, %c0_113] : memref<2x32x32xf32, #tpu.memory_space<vmem>>, vector<1x32x32xf32>
    %272 = vector.shape_cast %271 : vector<1x32x32xf32> to vector<32x32xf32>
    %cst_114 = arith.constant dense<0.000000e+00> : vector<8x32xf32>
    %273 = tpu.matmul %270, %272, %cst_114 {dimension_numbers = #tpu.dot_dimension_numbers<[1], [0], [0], [1], [0, 0, 1, 1], [], []>} : vector<8x32xf32>, vector<32x32xf32>, vector<8x32xf32> -> vector<8x32xf32>
    %c1_115 = arith.constant 1 : index
    %c0_116 = arith.constant 0 : index
    %c0_117 = arith.constant 0 : index
    %274 = vector.load %arg6[%c1_115, %c0_116, %c0_117] : memref<2x1x32xf32, #tpu.memory_space<vmem>>, vector<1x1x32xf32>
    %275 = vector.shape_cast %274 : vector<1x1x32xf32> to vector<1x32xf32>
    %276 = vector.broadcast %275 : vector<1x32xf32> to vector<8x32xf32>
    %277 = arith.addf %273, %276 : vector<8x32xf32>
    %278 = arith.addf %177, %277 : vector<8x32xf32>
    %c1_118 = arith.constant 1 : index
    %c0_119 = arith.constant 0 : index
    %c0_120 = arith.constant 0 : index
    %279 = vector.load %arg7[%c1_118, %c0_119, %c0_120] : memref<2x1x32xf32, #tpu.memory_space<vmem>>, vector<1x1x32xf32>
    %280 = vector.shape_cast %279 : vector<1x1x32xf32> to vector<1x32xf32>
    %c1_121 = arith.constant 1 : index
    %c0_122 = arith.constant 0 : index
    %c0_123 = arith.constant 0 : index
    %281 = vector.load %arg8[%c1_121, %c0_122, %c0_123] : memref<2x1x32xf32, #tpu.memory_space<vmem>>, vector<1x1x32xf32>
    %282 = vector.shape_cast %281 : vector<1x1x32xf32> to vector<1x32xf32>
    %cst_124 = arith.constant dense<0.000000e+00> : vector<8xf32>
    %283 = vector.multi_reduction <add>, %278, %cst_124 [1] : vector<8x32xf32> to vector<8xf32>
    %284 = vector.shape_cast %283 : vector<8xf32> to vector<8x1xf32>
    %cst_125 = arith.constant 3.200000e+01 : f32
    %285 = vector.broadcast %cst_125 : f32 to vector<8x1xf32>
    %286 = arith.divf %284, %285 : vector<8x1xf32>
    %287 = vector.broadcast %286 : vector<8x1xf32> to vector<8x32xf32>
    %288 = arith.subf %278, %287 : vector<8x32xf32>
    %289 = arith.mulf %288, %288 : vector<8x32xf32>
    %cst_126 = arith.constant dense<0.000000e+00> : vector<8xf32>
    %290 = vector.multi_reduction <add>, %289, %cst_126 [1] : vector<8x32xf32> to vector<8xf32>
    %291 = vector.shape_cast %290 : vector<8xf32> to vector<8x1xf32>
    %cst_127 = arith.constant 3.200000e+01 : f32
    %292 = vector.broadcast %cst_127 : f32 to vector<8x1xf32>
    %293 = arith.divf %291, %292 : vector<8x1xf32>
    %294 = vector.broadcast %286 : vector<8x1xf32> to vector<8x32xf32>
    %295 = arith.subf %278, %294 : vector<8x32xf32>
    %cst_128 = arith.constant 9.99999974E-6 : f32
    %296 = vector.broadcast %cst_128 : f32 to vector<8x1xf32>
    %297 = arith.addf %293, %296 : vector<8x1xf32>
    %298 = math.rsqrt %297 : vector<8x1xf32>
    %299 = vector.broadcast %298 : vector<8x1xf32> to vector<8x32xf32>
    %300 = arith.mulf %295, %299 : vector<8x32xf32>
    %301 = vector.broadcast %280 : vector<1x32xf32> to vector<8x32xf32>
    %302 = arith.mulf %300, %301 : vector<8x32xf32>
    %303 = vector.broadcast %282 : vector<1x32xf32> to vector<8x32xf32>
    %304 = arith.addf %302, %303 : vector<8x32xf32>
    %c1_129 = arith.constant 1 : index
    %c0_130 = arith.constant 0 : index
    %c0_131 = arith.constant 0 : index
    %305 = vector.load %arg9[%c1_129, %c0_130, %c0_131] : memref<2x32x128xf32, #tpu.memory_space<vmem>>, vector<1x32x128xf32>
    %306 = vector.shape_cast %305 : vector<1x32x128xf32> to vector<32x128xf32>
    %cst_132 = arith.constant dense<0.000000e+00> : vector<8x128xf32>
    %307 = tpu.matmul %304, %306, %cst_132 {dimension_numbers = #tpu.dot_dimension_numbers<[1], [0], [0], [1], [0, 0, 1, 1], [], []>} : vector<8x32xf32>, vector<32x128xf32>, vector<8x128xf32> -> vector<8x128xf32>
    %c1_133 = arith.constant 1 : index
    %c0_134 = arith.constant 0 : index
    %c0_135 = arith.constant 0 : index
    %308 = vector.load %arg10[%c1_133, %c0_134, %c0_135] : memref<2x1x128xf32, #tpu.memory_space<vmem>>, vector<1x1x128xf32>
    %309 = vector.shape_cast %308 : vector<1x1x128xf32> to vector<1x128xf32>
    %310 = vector.broadcast %309 : vector<1x128xf32> to vector<8x128xf32>
    %311 = arith.addf %307, %310 : vector<8x128xf32>
    %cst_136 = arith.constant 0.000000e+00 : f32
    %312 = vector.broadcast %cst_136 : f32 to vector<8x128xf32>
    %313 = arith.maximumf %311, %312 : vector<8x128xf32>
    %c1_137 = arith.constant 1 : index
    %c0_138 = arith.constant 0 : index
    %c0_139 = arith.constant 0 : index
    %314 = vector.load %arg11[%c1_137, %c0_138, %c0_139] : memref<2x128x32xf32, #tpu.memory_space<vmem>>, vector<1x128x32xf32>
    %315 = vector.shape_cast %314 : vector<1x128x32xf32> to vector<128x32xf32>
    %cst_140 = arith.constant dense<0.000000e+00> : vector<8x32xf32>
    %316 = tpu.matmul %313, %315, %cst_140 {dimension_numbers = #tpu.dot_dimension_numbers<[1], [0], [0], [1], [0, 0, 1, 1], [], []>} : vector<8x128xf32>, vector<128x32xf32>, vector<8x32xf32> -> vector<8x32xf32>
    %c1_141 = arith.constant 1 : index
    %c0_142 = arith.constant 0 : index
    %c0_143 = arith.constant 0 : index
    %317 = vector.load %arg12[%c1_141, %c0_142, %c0_143] : memref<2x1x32xf32, #tpu.memory_space<vmem>>, vector<1x1x32xf32>
    %318 = vector.shape_cast %317 : vector<1x1x32xf32> to vector<1x32xf32>
    %319 = vector.broadcast %318 : vector<1x32xf32> to vector<8x32xf32>
    %320 = arith.addf %316, %319 : vector<8x32xf32>
    %321 = arith.addf %304, %320 : vector<8x32xf32>
    %c1_144 = arith.constant 1 : index
    %c0_145 = arith.constant 0 : index
    %c0_146 = arith.constant 0 : index
    %322 = vector.load %arg13[%c1_144, %c0_145, %c0_146] : memref<2x1x32xf32, #tpu.memory_space<vmem>>, vector<1x1x32xf32>
    %323 = vector.shape_cast %322 : vector<1x1x32xf32> to vector<1x32xf32>
    %c1_147 = arith.constant 1 : index
    %c0_148 = arith.constant 0 : index
    %c0_149 = arith.constant 0 : index
    %324 = vector.load %arg14[%c1_147, %c0_148, %c0_149] : memref<2x1x32xf32, #tpu.memory_space<vmem>>, vector<1x1x32xf32>
    %325 = vector.shape_cast %324 : vector<1x1x32xf32> to vector<1x32xf32>
    %cst_150 = arith.constant dense<0.000000e+00> : vector<8xf32>
    %326 = vector.multi_reduction <add>, %321, %cst_150 [1] : vector<8x32xf32> to vector<8xf32>
    %327 = vector.shape_cast %326 : vector<8xf32> to vector<8x1xf32>
    %cst_151 = arith.constant 3.200000e+01 : f32
    %328 = vector.broadcast %cst_151 : f32 to vector<8x1xf32>
    %329 = arith.divf %327, %328 : vector<8x1xf32>
    %330 = vector.broadcast %329 : vector<8x1xf32> to vector<8x32xf32>
    %331 = arith.subf %321, %330 : vector<8x32xf32>
    %332 = arith.mulf %331, %331 : vector<8x32xf32>
    %cst_152 = arith.constant dense<0.000000e+00> : vector<8xf32>
    %333 = vector.multi_reduction <add>, %332, %cst_152 [1] : vector<8x32xf32> to vector<8xf32>
    %334 = vector.shape_cast %333 : vector<8xf32> to vector<8x1xf32>
    %cst_153 = arith.constant 3.200000e+01 : f32
    %335 = vector.broadcast %cst_153 : f32 to vector<8x1xf32>
    %336 = arith.divf %334, %335 : vector<8x1xf32>
    %337 = vector.broadcast %329 : vector<8x1xf32> to vector<8x32xf32>
    %338 = arith.subf %321, %337 : vector<8x32xf32>
    %cst_154 = arith.constant 9.99999974E-6 : f32
    %339 = vector.broadcast %cst_154 : f32 to vector<8x1xf32>
    %340 = arith.addf %336, %339 : vector<8x1xf32>
    %341 = math.rsqrt %340 : vector<8x1xf32>
    %342 = vector.broadcast %341 : vector<8x1xf32> to vector<8x32xf32>
    %343 = arith.mulf %338, %342 : vector<8x32xf32>
    %344 = vector.broadcast %323 : vector<1x32xf32> to vector<8x32xf32>
    %345 = arith.mulf %343, %344 : vector<8x32xf32>
    %346 = vector.broadcast %325 : vector<1x32xf32> to vector<8x32xf32>
    %347 = arith.addf %345, %346 : vector<8x32xf32>
    %c0_155 = arith.constant 0 : index
    %c0_156 = arith.constant 0 : index
    %348 = vector.load %arg15[%c0_155, %c0_156] : memref<8x32xf32, #tpu.memory_space<vmem>>, vector<8x32xf32>
    tpu.vector_store %arg15[%c0_155, %c0_156], %347 {strides = array<i32>} : memref<8x32xf32, #tpu.memory_space<vmem>>, vector<8x32xf32>,
    return
  }
  func.func @transform_0(%arg0: i32) -> (i32, i32) {
    %c0_i32 = arith.constant 0 : i32
    %c0_i32_0 = arith.constant 0 : i32
    return %arg0, %c0_i32 : i32, i32
  }
  func.func @transform_1(%arg0: i32) -> (i32, i32) {
    %c0_i32 = arith.constant 0 : i32
    %c0_i32_0 = arith.constant 0 : i32
    %c0_i32_1 = arith.constant 0 : i32
    return %c0_i32, %c0_i32_0 : i32, i32
  }
  func.func @transform_2(%arg0: i32) -> (i32, i32, i32) {
    %c0_i32 = arith.constant 0 : i32
    %c0_i32_0 = arith.constant 0 : i32
    %c0_i32_1 = arith.constant 0 : i32
    %c0_i32_2 = arith.constant 0 : i32
    return %c0_i32, %c0_i32_0, %c0_i32_1 : i32, i32, i32
  }
  func.func @transform_3(%arg0: i32) -> (i32, i32, i32) {
    %c0_i32 = arith.constant 0 : i32
    %c0_i32_0 = arith.constant 0 : i32
    %c0_i32_1 = arith.constant 0 : i32
    %c0_i32_2 = arith.constant 0 : i32
    return %c0_i32, %c0_i32_0, %c0_i32_1 : i32, i32, i32
  }
  func.func @transform_4(%arg0: i32) -> (i32, i32, i32) {
    %c0_i32 = arith.constant 0 : i32
    %c0_i32_0 = arith.constant 0 : i32
    %c0_i32_1 = arith.constant 0 : i32
    %c0_i32_2 = arith.constant 0 : i32
    return %c0_i32, %c0_i32_0, %c0_i32_1 : i32, i32, i32
  }
  func.func @transform_5(%arg0: i32) -> (i32, i32, i32) {
    %c0_i32 = arith.constant 0 : i32
    %c0_i32_0 = arith.constant 0 : i32
    %c0_i32_1 = arith.constant 0 : i32
    %c0_i32_2 = arith.constant 0 : i32
    return %c0_i32, %c0_i32_0, %c0_i32_1 : i32, i32, i32
  }
  func.func @transform_6(%arg0: i32) -> (i32, i32, i32) {
    %c0_i32 = arith.constant 0 : i32
    %c0_i32_0 = arith.constant 0 : i32
    %c0_i32_1 = arith.constant 0 : i32
    %c0_i32_2 = arith.constant 0 : i32
    return %c0_i32, %c0_i32_0, %c0_i32_1 : i32, i32, i32
  }
  func.func @transform_7(%arg0: i32) -> (i32, i32, i32) {
    %c0_i32 = arith.constant 0 : i32
    %c0_i32_0 = arith.constant 0 : i32
    %c0_i32_1 = arith.constant 0 : i32
    %c0_i32_2 = arith.constant 0 : i32
    return %c0_i32, %c0_i32_0, %c0_i32_1 : i32, i32, i32
  }
  func.func @transform_8(%arg0: i32) -> (i32, i32, i32) {
    %c0_i32 = arith.constant 0 : i32
    %c0_i32_0 = arith.constant 0 : i32
    %c0_i32_1 = arith.constant 0 : i32
    %c0_i32_2 = arith.constant 0 : i32
    return %c0_i32, %c0_i32_0, %c0_i32_1 : i32, i32, i32
  }
  func.func @transform_9(%arg0: i32) -> (i32, i32, i32) {
    %c0_i32 = arith.constant 0 : i32
    %c0_i32_0 = arith.constant 0 : i32
    %c0_i32_1 = arith.constant 0 : i32
    %c0_i32_2 = arith.constant 0 : i32
    return %c0_i32, %c0_i32_0, %c0_i32_1 : i32, i32, i32
  }
  func.func @transform_10(%arg0: i32) -> (i32, i32, i32) {
    %c0_i32 = arith.constant 0 : i32
    %c0_i32_0 = arith.constant 0 : i32
    %c0_i32_1 = arith.constant 0 : i32
    %c0_i32_2 = arith.constant 0 : i32
    return %c0_i32, %c0_i32_0, %c0_i32_1 : i32, i32, i32
  }
  func.func @transform_11(%arg0: i32) -> (i32, i32, i32) {
    %c0_i32 = arith.constant 0 : i32
    %c0_i32_0 = arith.constant 0 : i32
    %c0_i32_1 = arith.constant 0 : i32
    %c0_i32_2 = arith.constant 0 : i32
    return %c0_i32, %c0_i32_0, %c0_i32_1 : i32, i32, i32
  }
  func.func @transform_12(%arg0: i32) -> (i32, i32, i32) {
    %c0_i32 = arith.constant 0 : i32
    %c0_i32_0 = arith.constant 0 : i32
    %c0_i32_1 = arith.constant 0 : i32
    %c0_i32_2 = arith.constant 0 : i32
    return %c0_i32, %c0_i32_0, %c0_i32_1 : i32, i32, i32
  }
  func.func @transform_13(%arg0: i32) -> (i32, i32, i32) {
    %c0_i32 = arith.constant 0 : i32
    %c0_i32_0 = arith.constant 0 : i32
    %c0_i32_1 = arith.constant 0 : i32
    %c0_i32_2 = arith.constant 0 : i32
    return %c0_i32, %c0_i32_0, %c0_i32_1 : i32, i32, i32
  }
  func.func @transform_14(%arg0: i32) -> (i32, i32) {
    %c0_i32 = arith.constant 0 : i32
    %c0_i32_0 = arith.constant 0 : i32
    return %arg0, %c0_i32 : i32, i32
  }
}

</mosaic_0001>

<bundles_post_ra>
// kernel: shopping_transformer.1
= control target key start
LH: loop header
LB: loop body
LE: loop exit
PB: predicated region body
PF: predicated region fallthrough
CT: control target
= control target key end

     0   :  { %s3484_s29 = smov 0   ;;  %s3965_s0 = inlined_call_operand.vmem [shape: s32[16,1], index: 0, kind: input, shape index: {}]   ;;  %s3966_s1 = inlined_call_operand.vmem [shape: f32[56,32], index: 1, kind: input, shape index: {}]   ;;  %s3967_s2 = inlined_call_operand.vmem [shape: f32[2,32,96], index: 2, kind: input, shape index: {}]   ;;  %s3968_s3 = inlined_call_operand.vmem [shape: f32[2,1,96], index: 3, kind: input, shape index: {}]   ;;  %s3969_s4 = inlined_call_operand.vmem [shape: f32[2,32,32], index: 4, kind: input, shape index: {}]   ;;  %s3970_s5 = inlined_call_operand.vmem [shape: f32[2,1,32], index: 5, kind: input, shape index: {}]   ;;  %s3971_s6 = inlined_call_operand.vmem [shape: f32[2,1,32], index: 6, kind: input, shape index: {}]   ;;  %s3972_s7 = inlined_call_operand.vmem [shape: f32[2,1,32], index: 7, kind: input, shape index: {}]   ;;  %s3973_s8 = inlined_call_operand.vmem [shape: f32[2,32,128], index: 8, kind: input, shape index: {}]   ;;  %s3974_s9 = inlined_call_operand.vmem [shape: f32[2,1,128], index: 9, kind: input, shape index: {}]   ;;  %s3975_s10 = inlined_call_operand.vmem [shape: f32[2,128,32], index: 10, kind: input, shape index: {}]   ;;  %s3976_s11 = inlined_call_operand.vmem [shape: f32[2,1,32], index: 11, kind: input, shape index: {}]   ;;  %s3977_s12 = inlined_call_operand.vmem [shape: f32[2,1,32], index: 12, kind: input, shape index: {}]   ;;  %s3978_s13 = inlined_call_operand.vmem [shape: f32[2,1,32], index: 13, kind: input, shape index: {}]   ;;  %s3979_s14 = inlined_call_operand.vmem [shape: f32[16,32], index: 14, kind: output, shape index: {}]  }
   0x1 LB: > { %s2793_s30 = sadd.s32 4294967295, %s3389_s29   ;;  %p2797_p0 = scmp.ge.s32.totalorder %s3389_s29, 1  ;;  %s3389_s29 = sphi %s3484_s29, %s24_s29  }
   0x2   : > { %p411_p1 = scmp.lt.s32.totalorder %s3389_s29, 3 }
   0x4   : > { %p412_p2 = pnand %p2797_p0, %p411_p1 }
   0x5   : > { %p455_p3 = scmp.lt.s32.totalorder (!%p412_p2), %s2793_s30, 1  ;;  %v472_v0 = vld [vmem:[%s3966_s1] sm:$0xff] (!%p412_p2)  ;;  %v473_v1 = vld [vmem:[%s3966_s1 + $0x8] sm:$0xff] (!%p412_p2)  ;;  %v474_v2 = vld [vmem:[%s3966_s1 + $0x10] sm:$0xff] (!%p412_p2)  ;;  %v3391_v3 = vmov (!%p412_p2), 0   ;;  %v3392_v4 = vmov (!%p412_p2), 0.0|0.0   ;;  %v464_v14 = vlaneseq (!%p412_p2) }
   0x6   : > { %415 = sbr.rel (%p412_p2) target bundleno = 6370 (0x18e2), region = 76  ;;  %3342 = vset.pattern.permute.xlu0 (!%p412_p2), %v3391_v3  ;;  %3223 = vmatprep.subr.bf16.mxu1 (!%p412_p2), %v3392_v4  ;;  %v3224_v5 = vpack.c.bf16 (!%p412_p2), %v473_v1, %v472_v0  ;;  %v475_v6 = vld [vmem:[%s3966_s1 + $0x18] sm:$0xff] (!%p412_p2)  ;;  %v3393_v7 = vmov (!%p412_p2), 0.0   ;;  %v476_v9 = vld [vmem:[%s3966_s1 + $0x20] sm:$0xff] (!%p412_p2)  ;;  %v477_v10 = vld [vmem:[%s3966_s1 + $0x28] sm:$0xff] (!%p412_p2)  ;;  %vm3394_vm0 = vmmov (!%p412_p2), 0  }
   0x7   : > { %3028 = vmatprep.subr.mxu0 (!%p412_p2), %v3393_v7  ;;  %v3227_v8 = vpack.c.bf16 (!%p412_p2), %v475_v6, %v474_v2  ;;  %v3230_v12 = vpack.c.bf16 (!%p412_p2), %v477_v10, %v476_v9  ;;  %3004 = vmatprep.mubr.msk.f32.mxu1 (!%p412_p2), %vm3394_vm0, %v3393_v7  ;;  %v478_v13 = vld [vmem:[%s3966_s1 + $0x30] sm:$0xff] (!%p412_p2)  ;;  %v465_v15 = vand.u32 (!%p412_p2), 127, %v464_v14  ;;  %v553_v16 = vld [vmem:[%s3967_s2] sm:$0xff] (!%p412_p2)  ;;  %v554_v17 = vld [vmem:[%s3967_s2 + $0x8] sm:$0xff] (!%p412_p2)  ;;  %vm479_vm1 = vcmask (!%p412_p2), 457728   ;;  %s3396_s17 = smov (!%p412_p2), 96  }
   0x8   : > { %3225 = vmatpush3.bf16.msra.mxu1 (!%p412_p2), %v3224_v5  ;;  %3030 = vmatprep.mubr.msk.f32.mxu0 (!%p412_p2), %vm3394_vm0, %v3393_v7  ;;  %v3233_v19 = vpack.c.bf16 (!%p412_p2), %v554_v17, %v553_v16  ;;  %v555_v20 = vld [vmem:[%s3967_s2 + $0x10] sm:$0xff] (!%p412_p2)  ;;  %v556_v21 = vld [vmem:[%s3967_s2 + $0x18] sm:$0xff] (!%p412_p2)  ;;  %vm564_vm3 = vcmask (!%p412_p2), 261120   ;;  %v2802_v26 = vld [vmem:[%s3968_s3] ss:$0 sm:$0xff] (!%p412_p2)  ;;  %s3397_s18 = smov (!%p412_p2), 80  }
   0x9   : > { %3226 = vmatprep.subr.bf16.mxu1 (!%p412_p2), %v3392_v4  ;;  %v3236_v23 = vpack.c.bf16 (!%p412_p2), %v556_v21, %v555_v20  ;;  %s3398_s19 = smov (!%p412_p2), 120   ;;  %s3983_s20 = smov (!%p412_p2), 72   ;;  %vm642_vm4 = vcmask (!%p412_p2), 64512   ;;  %vm975_vm5 = vcmask (!%p412_p2), 130112   ;;  %vm1146_vm6 = vcmask (!%p412_p2), 195712  }
   0xa   : > { %s3989_s21 = smov (!%p412_p2), 112   ;;  %s3985_s22 = smov (!%p412_p2), 104   ;;  %vm1317_vm7 = vcmask (!%p412_p2), 261312  }
   0xb   : > { %s3402_s24 = smov (!%p412_p2), 64   ;;  %s3982_s25 = smov (!%p412_p2), 48  }
   0xc   : > { %3228 = vmatpush3.bf16.msra.mxu1 (!%p412_p2), %v3227_v8  ;;  %s3981_s26 = smov (!%p412_p2), 40   ;;  %s3984_s27 = smov (!%p412_p2), 56  }
   0xd   : > { %s4001_s30 = smov (!%p455_p3, %s2793_s30), 1  ;;  %3229 = vmatprep.subr.bf16.mxu1 %v3392_v4  ;;  %s3996_s28 = smov 40  }
   0xe   : > { %s3980_s23 = sshll.u32 %s4001_s30, 3 }
   0xf   : > { %s458_s16 = scalar_lea.vmem %s3965_s0, %s3980_s23  ;;  %s3988_s23 = smov 8  }
  0x10   : > { %v463_v11 = vld [vmem:[%s458_s16] sm:$0xff]  ;;  %3231 = vmatpush3.bf16.msra.mxu1 %v3230_v12  ;;  %s3395_s16 = smov 88  }
  0x11   : > { %467 = vperm.xlu0 %3342, %v463_v11   ;;  %3002 = vmatprep.subr.mxu1 %v3393_v7 }
  0x14   : > { %3003 = vmatpush3.msra.mxu1 %v478_v13 }
  0x15   : > { %3232 = vmatprep.subr.bf16.mxu1 %v3392_v4 }
  0x90   : > { %v468_v18 = vpop.permute.xlu0 %467 }
  0x91   : > { %vm469_vm2 = vcmp.eq.s32.totalorder %v465_v15, %v468_v18 }
  0x92   : > { %v2800_v22 = vsel %vm469_vm2, 1.0, %v3393_v7 }
  0x93   : > { %3005 = vmatmul.mubr.msk.f32.vlgmr.msra.gmra.mrb[0].mxu1 %vm479_vm1, %v2800_v22 }
  0x94   : > { %3234 = vmatpush3.bf16.msra.mxu1 %v3233_v19  ;;  %3015 = vmatprep.mubr.msk.f32.mxu1 %vm3394_vm0, %v3393_v7 }
  0x95   : > { %3235 = vmatprep.subr.bf16.mxu1 %v3392_v4 }
  0x98   : > { %3237 = vmatpush3.bf16.msra.mxu1 %v3236_v23 }
  0x99   : > { %3018 = vmatprep.subr.mxu1 %v3393_v7 }
 0x166   : > { %v3548_v24 = vpop.f32.mrb[0].mxu1 }
 0x167   : > { %v3006_v25 = vpop.f32.mrb[1].mxu1  ;;  %3016 = vmatmul.mubr.msk.f32.vlgmr.msra.gmra.mrb[2].mxu1 %vm564_vm3, %v3548_v24 }
 0x168   : > { %3020 = vmatprep.mubr.msk.f32.mxu1 %vm3394_vm0, %v3393_v7  ;;  %v1320_v25 = vld [vmem:[%s3969_s4] sm:$0xff] }
 0x23a   : > { %v634_v27 = vpop.f32.mrb[2].mxu1 }
 0x23b   : > { %v3557_v28 = vadd.f32 %v2802_v26, %v634_v27  ;;  %v3017_v29 = vpop.f32.mrb[3].mxu1  ;;  %v1321_v26 = vld [vmem:[%s3969_s4 + $0x8] sm:$0xff] }
 0x23c   : > { %v1322_v29 = vld [vmem:[%s3969_s4 + $0x10] sm:$0xff] }
 0x23d   : > { %808 = vrot.lane.b32.xlu1 %v3557_v28, %s3395_s16  ;;  %640 = vrot.lane.b32.xlu0 %v3557_v28, %s3396_s17  ;;  %v638_v30 = vmul.f32 0.35355338, %v3557_v28 }
 0x241   : > { %979 = vrot.lane.b32.xlu0 %v3557_v28, %s3397_s18  ;;  %806 = vrot.lane.b32.xlu1 %v638_v30, %s3398_s19 }
 0x245   : > { %1150 = vrot.lane.b32.xlu0 %v3557_v28, %s3983_s20  ;;  %977 = vrot.lane.b32.xlu1 %v638_v30, %s3989_s21  ;;  %s3987_s20 = smov 16  }
 0x249   : > { %1148 = vrot.lane.b32.xlu1 %v638_v30, %s3985_s22  ;;  %s3986_s22 = smov 24  }
 0x2af   : > { %v809_v31 = vpop.permute.xlu1 %808  ;;  %v641_v32 = vpop.permute.xlu0 %640 }
 0x2b0   : > { %3019 = vmatpush3.xpose.msk.msra.mxu1 %vm642_vm4, %v641_v32  ;;  %3029 = vmatpush3.xpose.msk.msra.mxu0 %vm642_vm4, %v809_v31 }
 0x2b1   : > { %3038 = vmatprep.subr.mxu0 %v3393_v7  ;;  %3023 = vmatprep.subr.mxu1 %v3393_v7 }
 0x2b3   : > { %v980_v33 = vpop.permute.xlu0 %979  ;;  %v807_v34 = vpop.permute.xlu1 %806  ;;  %3021 = vmatmul.mubr.msk.f32.vlgmr.msra.gmra.mrb[4].mxu1 %vm642_vm4, %v638_v30  ;;  %v1323_v30 = vld [vmem:[%s3969_s4 + $0x18] sm:$0xff] }
 0x2b4   : > { %3031 = vmatmul.mubr.msk.f32.vlgmr.msra.gmra.mrb[0].mxu0 %vm642_vm4, %v807_v34  ;;  %3025 = vmatprep.mubr.msk.f32.mxu1 %vm3394_vm0, %v3393_v7  ;;  %v3242_v32 = vpack.c.bf16 %v1323_v30, %v1322_v29  ;;  %v1535_v29 = vld [vmem:[%s3975_s10 + $0x78] sm:$0xff] }
 0x2b5   : > { %3039 = vmatpush3.xpose.msk.msra.mxu0 %vm642_vm4, %v980_v33  ;;  %3040 = vmatprep.mubr.msk.f32.mxu0 %vm3394_vm0, %v3393_v7 }
 0x2b6   : > { %3048 = vmatprep.subr.mxu0 %v3393_v7 }
 0x2b7   : > { %v1151_v35 = vpop.permute.xlu0 %1150  ;;  %v978_v36 = vpop.permute.xlu1 %977 }
 0x2b8   : > { %3041 = vmatmul.mubr.msk.f32.vlgmr.msra.gmra.mrb[2].mxu0 %vm642_vm4, %v978_v36 }
 0x2b9   : > { %3049 = vmatpush3.xpose.msk.msra.mxu0 %vm642_vm4, %v1151_v35  ;;  %3050 = vmatprep.mubr.msk.f32.mxu0 %vm3394_vm0, %v3393_v7 }
 0x2ba   : > { %3238 = vmatprep.subr.bf16.mxu0 %v3392_v4 }
 0x2bb   : > { %v1149_v37 = vpop.permute.xlu1 %1148 }
 0x2bc   : > { %3051 = vmatmul.mubr.msk.f32.vlgmr.msra.gmra.mrb[4].mxu0 %vm642_vm4, %v1149_v37 }
 0x2bd   : > { %3066 = vmatprep.mubr.msk.f32.mxu0 %vm3394_vm0, %v3393_v7 }
 0x386   : > { %v714_v38 = vpop.f32.mrb[4].mxu1 }
 0x387   : > { %v3022_v39 = vpop.f32.mrb[5].mxu1  ;;  %v880_v40 = vpop.f32.mrb[0].mxu0  ;;  %v718_v41 = vsel %vm642_vm4, %v714_v38, -inf }
 0x388   : > { %v3032_v42 = vpop.f32.mrb[1].mxu0  ;;  %719 = vmax.xlane.f32.xlu0 %v718_v41  ;;  %v884_v43 = vsel %vm642_vm4, %v880_v40, -inf }
 0x389   : > { %885 = vmax.xlane.f32.xlu1 %v884_v43  ;;  %v2816_v43 = vld [vmem:[%s3970_s5] ss:$0 sm:$0xff] }
 0x38b   : > { %v1051_v44 = vpop.f32.mrb[2].mxu0 }
 0x38c   : > { %v3042_v45 = vpop.f32.mrb[3].mxu0  ;;  %v1055_v46 = vsel %vm642_vm4, %v1051_v44, -inf }
 0x38d   : > { %1056 = vmax.xlane.f32.xlu0 %v1055_v46 }
 0x38f   : > { %v1222_v47 = vpop.f32.mrb[4].mxu0 }
 0x390   : > { %v3052_v48 = vpop.f32.mrb[5].mxu0  ;;  %v1226_v49 = vsel %vm642_vm4, %v1222_v47, -inf }
 0x391   : > { %1227 = vmax.xlane.f32.xlu0 %v1226_v49 }
 0x39a   : > { %729 = vrot.lane.b32.xlu1 %v3557_v28, %s3402_s24 }
 0x415   : > { %v720_v50 = vpop.xlane.xlu0 %719 }
 0x416   : > { %v721_v51 = vsub.f32 %v714_v38, %v720_v50  ;;  %v886_v52 = vpop.xlane.xlu1 %885 }
 0x417   : > { %v887_v53 = vsub.f32 %v880_v40, %v886_v52 }
 0x418   : > { %v722_v54 = vmul.f32 1.442695, %v721_v51 }
 0x419   : > { %v888_v55 = vmul.f32 1.442695, %v887_v53 }
 0x41a   : > { %3343 = vpow2.f32 %v722_v54  ;;  %v730_v56 = vpop.permute.xlu1 %729  ;;  %v1057_v57 = vpop.xlane.xlu0 %1056  ;;  %v1435_v54 = vld [vmem:[%s3973_s8] sm:$0xff] }
 0x41b   : > { %3345 = vpow2.f32 %v888_v55  ;;  %v1058_v58 = vsub.f32 %v1051_v44, %v1057_v57  ;;  %3024 = vmatpush3.msra.mxu1 %v730_v56  ;;  %v1436_v55 = vld [vmem:[%s3973_s8 + $0x8] sm:$0xff]  ;;  %v1438_v57 = vld [vmem:[%s3973_s8 + $0x18] sm:$0xff] }
 0x41c   : > { %3033 = vmatprep.subr.mxu1 %v3393_v7  ;;  %v3245_v56 = vpack.c.bf16 %v1436_v55, %v1435_v54 }
 0x41d   : > { %v1059_v59 = vmul.f32 1.442695, %v1058_v58 }
 0x41e   : > { %v1228_v60 = vpop.xlane.xlu0 %1227 }
 0x41f   : > { %3347 = vpow2.f32 %v1059_v59  ;;  %v1229_v61 = vsub.f32 %v1222_v47, %v1228_v60  ;;  %v1520_v59 = vld [vmem:[%s3975_s10] sm:$0xff]  ;;  %v1521_v60 = vld [vmem:[%s3975_s10 + $0x8] sm:$0xff] }
 0x421   : > { %v1230_v62 = vmul.f32 1.442695, %v1229_v61  ;;  %v1522_v61 = vld [vmem:[%s3975_s10 + $0x10] sm:$0xff] }
 0x423   : > { %3349 = vpow2.f32 %v1230_v62  ;;  %v3251_v62 = vpack.c.bf16 %v1521_v60, %v1520_v59 }
 0x424   : > { %v3344_v63 = vpop.eup %3343 }
 0x425   : > { %v3346_v0 = vpop.eup %3345  ;;  %v724_v1 = vsel %vm642_vm4, %v3344_v63, 0.0 }
 0x426   : > { %725 = vadd.xlane.f32.xlu1 %v724_v1  ;;  %v890_v2 = vsel %vm642_vm4, %v3346_v0, 0.0  ;;  %v1524_v1 = vld [vmem:[%s3975_s10 + $0x20] sm:$0xff] }
 0x427   : > { %891 = vadd.xlane.f32.xlu0 %v890_v2  ;;  %v1525_v2 = vld [vmem:[%s3975_s10 + $0x28] sm:$0xff] }
 0x429   : > { %v3348_v3 = vpop.eup %3347 }
 0x42a   : > { %v1061_v5 = vsel %vm642_vm4, %v3348_v3, 0.0 }
 0x42b   : > { %1062 = vadd.xlane.f32.xlu1 %v1061_v5  ;;  %v1526_v5 = vld [vmem:[%s3975_s10 + $0x30] sm:$0xff] }
 0x42d   : > { %v3350_v6 = vpop.eup %3349 }
 0x42e   : > { %v1232_v8 = vsel %vm642_vm4, %v3350_v6, 0.0 }
 0x42f   : > { %1233 = vadd.xlane.f32.xlu0 %v1232_v8 }
 0x43c   : > { %1066 = vrot.lane.b32.xlu1 %v3557_v28, %s3982_s25 }
 0x440   : > { %1237 = vrot.lane.b32.xlu1 %v3557_v28, %s3981_s26 }
 0x445   : > { %895 = vrot.lane.b32.xlu0 %v3557_v28, %s3984_s27  ;;  %v3239_v28 = vpack.c.bf16 %v1321_v26, %v1320_v25  ;;  %v2819_v25 = vld [vmem:[%s3972_s7] ss:$0 sm:$0xff]  ;;  %s3995_s27 = smov 8  }
 0x447   : > { %3240 = vmatpush3.bf16.msra.mxu0 %v3239_v28  ;;  %v1534_v28 = vld [vmem:[%s3975_s10 + $0x70] sm:$0xff] }
 0x448   : > { %3241 = vmatprep.subr.bf16.mxu0 %v3392_v4  ;;  %v3272_v30 = vpack.c.bf16 %v1535_v29, %v1534_v28 }
 0x44b   : > { %3243 = vmatpush3.bf16.msra.mxu0 %v3242_v32 }
 0x44c   : > { %3250 = vmatprep.subr.bf16.mxu0 %v3392_v4 }
 0x4b3   : > { %v726_v9 = vpop.xlane.xlu1 %725 }
 0x4b4   : > { %3351 = vrcp.f32 %v726_v9  ;;  %v892_v10 = vpop.xlane.xlu0 %891  ;;  %v1528_v9 = vld [vmem:[%s3975_s10 + $0x40] sm:$0xff] }
 0x4b5   : > { %3353 = vrcp.f32 %v892_v10  ;;  %v1529_v10 = vld [vmem:[%s3975_s10 + $0x48] sm:$0xff] }
 0x4b8   : > { %v1063_v11 = vpop.xlane.xlu1 %1062 }
 0x4b9   : > { %3355 = vrcp.f32 %v1063_v11  ;;  %v3263_v11 = vpack.c.bf16 %v1529_v10, %v1528_v9 }
 0x4bc   : > { %v1234_v12 = vpop.xlane.xlu0 %1233  ;;  %v1067_v18 = vpop.permute.xlu1 %1066 }
 0x4bd   : > { %3357 = vrcp.f32 %v1234_v12  ;;  %v1530_v12 = vld [vmem:[%s3975_s10 + $0x50] sm:$0xff] }
 0x4be   : > { %v3352_v13 = vpop.eup %3351 }
 0x4bf   : > { %v728_v14 = vmul.f32 %v3352_v13, %v3344_v63  ;;  %v3354_v15 = vpop.eup %3353  ;;  %v1523_v63 = vld [vmem:[%s3975_s10 + $0x18] sm:$0xff] }
 0x4c0   : > { %v896_v16 = vpop.permute.xlu0 %895  ;;  %v894_v17 = vmul.f32 %v3354_v15, %v3346_v0  ;;  %v1238_v22 = vpop.permute.xlu1 %1237  ;;  %v3254_v0 = vpack.c.bf16 %v1523_v63, %v1522_v61  ;;  %v1531_v13 = vld [vmem:[%s3975_s10 + $0x58] sm:$0xff]  ;;  %v1532_v15 = vld [vmem:[%s3975_s10 + $0x60] sm:$0xff] }
 0x4c1   : > { %3026 = vmatmul.mubr.msk.f32.vlgmr.msra.gmra.mrb[6].mxu1 %vm642_vm4, %v728_v14  ;;  %v3266_v14 = vpack.c.bf16 %v1531_v13, %v1530_v12  ;;  %v2830_v61 = vld [vmem:[%s3968_s3 + $0x1] ss:$0 sm:$0xff] }
 0x4c2   : > { %3034 = vmatpush3.msra.mxu1 %v896_v16  ;;  %3035 = vmatprep.mubr.msk.f32.mxu1 %vm3394_vm0, %v3393_v7  ;;  %v1533_v16 = vld [vmem:[%s3975_s10 + $0x68] sm:$0xff] }
 0x4c3   : > { %3043 = vmatprep.subr.mxu1 %v3393_v7  ;;  %v3356_v19 = vpop.eup %3355 }
 0x4c4   : > { %v1065_v20 = vmul.f32 %v3356_v19, %v3348_v3  ;;  %v3257_v3 = vpack.c.bf16 %v1525_v2, %v1524_v1 }
 0x4c5   : > { %3036 = vmatmul.mubr.msk.f32.vlgmr.msra.gmra.mrb[8].mxu1 %vm642_vm4, %v894_v17  ;;  %v3269_v17 = vpack.c.bf16 %v1533_v16, %v1532_v15 }
 0x4c6   : > { %3044 = vmatpush3.msra.mxu1 %v1067_v18  ;;  %3045 = vmatprep.mubr.msk.f32.mxu1 %vm3394_vm0, %v3393_v7 }
 0x4c7   : > { %3053 = vmatprep.subr.mxu1 %v3393_v7  ;;  %v3358_v21 = vpop.eup %3357 }
 0x4c8   : > { %v1236_v23 = vmul.f32 %v3358_v21, %v3350_v6  ;;  %v1527_v6 = vld [vmem:[%s3975_s10 + $0x38] sm:$0xff] }
 0x4c9   : > { %3046 = vmatmul.mubr.msk.f32.vlgmr.msra.gmra.mrb[10].mxu1 %vm642_vm4, %v1065_v20  ;;  %v3260_v8 = vpack.c.bf16 %v1527_v6, %v1526_v5 }
 0x4ca   : > { %3054 = vmatpush3.msra.mxu1 %v1238_v22  ;;  %3055 = vmatprep.mubr.msk.f32.mxu1 %vm3394_vm0, %v3393_v7  ;;  %v2818_v22 = vld [vmem:[%s3971_s6] ss:$0 sm:$0xff] }
 0x4cb   : > { %3244 = vmatprep.subr.bf16.mxu1 %v3392_v4 }
 0x4cd   : > { %3056 = vmatmul.mubr.msk.f32.vlgmr.msra.gmra.mrb[12].mxu1 %vm642_vm4, %v1236_v23 }
 0x4ce   : > { %3077 = vmatprep.mubr.msk.f32.mxu1 %vm3394_vm0, %v3393_v7  ;;  %3246 = vmatpush3.bf16.msra.mxu1 %v3245_v56 }
 0x4cf   : > { %3247 = vmatprep.subr.bf16.mxu1 %v3392_v4 }
 0x594   : > { %v801_v27 = vpop.f32.mrb[6].mxu1 }
 0x595   : > { %805 = vst.msk [vmem:[#allocation2] sm:$0xff] %vm642_vm4, %v801_v27  ;;  %v3027_v31 = vpop.f32.mrb[7].mxu1 }
 0x596   : > { %v2820_v31 = vld [vmem:[%s3974_s9] ss:$0 sm:$0xff] }
 0x598   : > { %v967_v33 = vpop.f32.mrb[8].mxu1 }
 0x599   : > { %972 = vrot.lane.b32.xlu0 %v967_v33, %s3988_s23  ;;  %v3037_v34 = vpop.f32.mrb[9].mxu1 }
 0x59c   : > { %v1138_v35 = vpop.f32.mrb[10].mxu1 }
 0x59d   : > { %1143 = vrot.lane.b32.xlu1 %v1138_v35, %s3987_s20  ;;  %v3047_v36 = vpop.f32.mrb[11].mxu1 }
 0x59e   : > { %v2822_v36 = vld [vmem:[%s3976_s11] ss:$0 sm:$0xff] }
 0x5a0   : > { %v1309_v37 = vpop.f32.mrb[12].mxu1 }
 0x5a1   : > { %1314 = vrot.lane.b32.xlu0 %v1309_v37, %s3986_s22  ;;  %v3057_v38 = vpop.f32.mrb[13].mxu1 }
 0x60b   : > { %v973_v39 = vpop.permute.xlu0 %972 }
 0x60c   : > { %976 = vst.msk [vmem:[#allocation2] sm:$0xff] %vm975_vm5, %v973_v39 }
 0x60f   : > { %v1144_v40 = vpop.permute.xlu1 %1143 }
 0x610   : > { %1147 = vst.msk [vmem:[#allocation2] sm:$0xff] %vm1146_vm6, %v1144_v40 }
 0x613   : > { %v1315_v41 = vpop.permute.xlu0 %1314 }
 0x614   : > { %1318 = vst.msk [vmem:[#allocation2] sm:$0xff] %vm1317_vm7, %v1315_v41 }
 0x61b   : > { %v1319_v42 = vld [vmem:[#allocation2] sm:$0xff] }
 0x61c   : > { %3067 = vmatmul.mubr.msk.f32.vlgmr.msra.gmra.mrb[6].mxu0 %vm564_vm3, %v1319_v42 }
 0x61d   : > { %3112 = vmatprep.mubr.msk.f32.mxu0 %vm3394_vm0, %v3393_v7  ;;  %3252 = vmatpush3.bf16.msra.mxu0 %v3251_v62 }
 0x61e   : > { %3253 = vmatprep.subr.bf16.mxu0 %v3392_v4 }
 0x621   : > { %3255 = vmatpush3.bf16.msra.mxu0 %v3254_v0 }
 0x622   : > { %3256 = vmatprep.subr.bf16.mxu0 %v3392_v4 }
 0x625   : > { %3258 = vmatpush3.bf16.msra.mxu0 %v3257_v3 }
 0x626   : > { %3259 = vmatprep.subr.bf16.mxu0 %v3392_v4 }
 0x629   : > { %3261 = vmatpush3.bf16.msra.mxu0 %v3260_v8 }
 0x62a   : > { %3262 = vmatprep.subr.bf16.mxu0 %v3392_v4 }
 0x62d   : > { %3264 = vmatpush3.bf16.msra.mxu0 %v3263_v11 }
 0x62e   : > { %3265 = vmatprep.subr.bf16.mxu0 %v3392_v4 }
 0x631   : > { %3267 = vmatpush3.bf16.msra.mxu0 %v3266_v14 }
 0x632   : > { %3268 = vmatprep.subr.bf16.mxu0 %v3392_v4 }
 0x635   : > { %3270 = vmatpush3.bf16.msra.mxu0 %v3269_v17 }
 0x636   : > { %3271 = vmatprep.subr.bf16.mxu0 %v3392_v4 }
 0x639   : > { %3273 = vmatpush3.bf16.msra.mxu0 %v3272_v30 }
 0x63a   : > { %3156 = vmatprep.subr.mxu0 %v3393_v7 }
 0x6ef   : > { %v1400_v44 = vpop.f32.mrb[6].mxu0 }
 0x6f0   : > { %v1401_v45 = vadd.f32 %v2816_v43, %v1400_v44  ;;  %v3068_v46 = vpop.f32.mrb[7].mxu0 }
 0x6f2   : > { %v1404_v47 = vadd.f32 %v1401_v45, %v3548_v24  ;;  %v1437_v24 = vld [vmem:[%s3973_s8 + $0x10] sm:$0xff] }
 0x6f3   : > { %v3248_v58 = vpack.c.bf16 %v1438_v57, %v1437_v24  ;;  %v2823_v24 = vld [vmem:[%s3977_s12] ss:$0 sm:$0xff] }
 0x6f4   : > { %v1407_v48 = vsel %vm564_vm3, %v1404_v47, 0.0 }
 0x6f5   : > { %1408 = vadd.xlane.f32.xlu1 %v1407_v48  ;;  %3249 = vmatpush3.bf16.msra.mxu1 %v3248_v58  ;;  %v2826_v48 = vld [vmem:[%s3967_s2 + $0x28] sm:$0xff]  ;;  %v2824_v58 = vld [vmem:[%s3978_s13] ss:$0 sm:$0xff] }
 0x6f6   : > { %3274 = vmatprep.subr.bf16.mxu1 %v3392_v4 }
 0x782   : > { %v1409_v49 = vpop.xlane.xlu1 %1408 }
 0x783   : > { %v1411_v50 = vmul.f32 0.03125, %v1409_v49 }
 0x785   : > { %v1412_v51 = vsub.f32 %v1404_v47, %v1411_v50  ;;  %v2825_v47 = vld [vmem:[%s3967_s2 + $0x20] sm:$0xff]  ;;  %v2827_v50 = vld [vmem:[%s3967_s2 + $0x30] sm:$0xff] }
 0x786   : > { %v3275_v49 = vpack.c.bf16 %v2826_v48, %v2825_v47 }
 0x787   : > { %v1413_v52 = vmul.f32 %v1412_v51, %v1412_v51 }
 0x789   : > { %v1414_v53 = vsel %vm564_vm3, %v1413_v52, 0.0 }
 0x78a   : > { %1415 = vadd.xlane.f32.xlu0 %v1414_v53 }
 0x817   : > { %v1416_v18 = vpop.xlane.xlu0 %1415 }
 0x818   : > { %v1417_v19 = vmul.f32 0.03125, %v1416_v18 }
 0x81a   : > { %v1418_v20 = vadd.f32 1e-05, %v1417_v19 }
 0x81c   : > { %3359 = vrsqrt.f32 %v1418_v20 }
 0x826   : > { %v3360_v21 = vpop.eup %3359 }
 0x827   : > { %v1420_v23 = vmul.f32 %v3360_v21, %v1412_v51  ;;  %v2828_v51 = vld [vmem:[%s3967_s2 + $0x38] sm:$0xff] }
 0x828   : > { %v3278_v52 = vpack.c.bf16 %v2828_v51, %v2827_v50 }
 0x829   : > { %v1427_v26 = vmul.f32 %v2818_v22, %v1420_v23 }
 0x82b   : > { %v1434_v27 = vadd.f32 %v2819_v25, %v1427_v26 }
 0x82d   : > { %3078 = vmatmul.mubr.msk.f32.vlgmr.msra.gmra.mrb[14].mxu1 %vm564_vm3, %v1434_v27 }
 0x82e   : > { %3123 = vmatprep.mubr.msk.f32.mxu1 %vm3394_vm0, %v3393_v7  ;;  %3276 = vmatpush3.bf16.msra.mxu1 %v3275_v49 }
 0x82f   : > { %3277 = vmatprep.subr.bf16.mxu1 %v3392_v4 }
 0x832   : > { %3279 = vmatpush3.bf16.msra.mxu1 %v3278_v52 }
 0x833   : > { %3126 = vmatprep.subr.mxu1 %v3393_v7 }
 0x900   : > { %v1515_v32 = vpop.f32.mrb[14].mxu1 }
 0x901   : > { %v1516_v33 = vadd.f32 %v2820_v31, %v1515_v32  ;;  %v3079_v34 = vpop.f32.mrb[15].mxu1 }
 0x903   : > { %v1519_v35 = vmax.f32 %v1516_v33, 0.0 }
 0x905   : > { %3113 = vmatmul.mubr.f32.vlgmr.msra.gmra.mrb[8].mxu0 %v1519_v35 }
 0x906   : > { %3158 = vmatprep.mubr.msk.f32.mxu0 %vm3394_vm0, %v3393_v7 }
 0x9d8   : > { %v1609_v37 = vpop.f32.mrb[8].mxu0 }
 0x9d9   : > { %v1610_v38 = vadd.f32 %v2822_v36, %v1609_v37  ;;  %v3114_v39 = vpop.f32.mrb[9].mxu0 }
 0x9db   : > { %v1613_v40 = vadd.f32 %v1610_v38, %v1434_v27 }
 0x9dd   : > { %v1616_v41 = vsel %vm564_vm3, %v1613_v40, 0.0 }
 0x9de   : > { %1617 = vadd.xlane.f32.xlu0 %v1616_v41 }
 0xa6b   : > { %v1618_v42 = vpop.xlane.xlu0 %1617 }
 0xa6c   : > { %v1619_v43 = vmul.f32 0.03125, %v1618_v42 }
 0xa6e   : > { %v1620_v44 = vsub.f32 %v1613_v40, %v1619_v43 }
 0xa70   : > { %v1621_v45 = vmul.f32 %v1620_v44, %v1620_v44 }
 0xa72   : > { %v1622_v46 = vsel %vm564_vm3, %v1621_v45, 0.0 }
 0xa73   : > { %1623 = vadd.xlane.f32.xlu1 %v1622_v46 }
 0xb00   : > { %v1624_v53 = vpop.xlane.xlu1 %1623 }
 0xb01   : > { %v1625_v54 = vmul.f32 0.03125, %v1624_v53 }
 0xb03   : > { %v1626_v55 = vadd.f32 1e-05, %v1625_v54 }
 0xb05   : > { %3361 = vrsqrt.f32 %v1626_v55 }
 0xb0f   : > { %v3362_v56 = vpop.eup %3361 }
 0xb10   : > { %v1628_v57 = vmul.f32 %v3362_v56, %v1620_v44 }
 0xb12   : > { %v1635_v59 = vmul.f32 %v2823_v24, %v1628_v57 }
 0xb14   : > { %v3762_v60 = vadd.f32 %v2824_v58, %v1635_v59 }
 0xb16   : > { %3124 = vmatmul.mubr.msk.f32.vlgmr.msra.gmra.mrb[16].mxu1 %vm564_vm3, %v3762_v60 }
 0xb17   : > { %3128 = vmatprep.mubr.msk.f32.mxu1 %vm3394_vm0, %v3393_v7 }
 0xbe9   : > { %v1725_v62 = vpop.f32.mrb[16].mxu1 }
 0xbea   : > { %v3771_v63 = vadd.f32 %v2830_v61, %v1725_v62  ;;  %v3125_v0 = vpop.f32.mrb[17].mxu1 }
 0xbec   : > { %1731 = vrot.lane.b32.xlu0 %v3771_v63, %s3396_s17  ;;  %v1729_v1 = vmul.f32 0.35355338, %v3771_v63  ;;  %s3991_s17 = smov 104  }
 0xbf0   : > { %1898 = vrot.lane.b32.xlu0 %v3771_v63, %s3395_s16  ;;  %s3990_s16 = smov 112  }
 0xbf4   : > { %1896 = vrot.lane.b32.xlu0 %v1729_v1, %s3398_s19  ;;  %s3992_s19 = smov 56  }
 0xc5e   : > { %v1732_v2 = vpop.permute.xlu0 %1731 }
 0xc5f   : > { %3127 = vmatpush3.xpose.msk.msra.mxu1 %vm642_vm4, %v1732_v2  ;;  %v2845_v2 = vld [vmem:[%s3969_s4 + $0x28] sm:$0xff] }
 0xc60   : > { %3131 = vmatprep.subr.mxu1 %v3393_v7 }
 0xc62   : > { %3129 = vmatmul.mubr.msk.f32.vlgmr.msra.gmra.mrb[18].mxu1 %vm642_vm4, %v1729_v1  ;;  %v1899_v16 = vpop.permute.xlu0 %1898 }
 0xc63   : > { %3133 = vmatprep.mubr.msk.f32.mxu1 %vm3394_vm0, %v3393_v7 }
 0xc66   : > { %v1897_v18 = vpop.permute.xlu0 %1896 }
 0xd35   : > { %v1804_v3 = vpop.f32.mrb[18].mxu1 }
 0xd36   : > { %v3130_v5 = vpop.f32.mrb[19].mxu1  ;;  %v1808_v6 = vsel %vm642_vm4, %v1804_v3, -inf }
 0xd37   : > { %1809 = vmax.xlane.f32.xlu1 %v1808_v6  ;;  %v2846_v5 = vld [vmem:[%s3969_s4 + $0x30] sm:$0xff]  ;;  %v2847_v6 = vld [vmem:[%s3969_s4 + $0x38] sm:$0xff] }
 0xdc4   : > { %v1810_v8 = vpop.xlane.xlu1 %1809 }
 0xdc5   : > { %v1811_v9 = vsub.f32 %v1804_v3, %v1810_v8  ;;  %v3284_v8 = vpack.c.bf16 %v2847_v6, %v2846_v5  ;;  %v2879_v6 = vld [vmem:[%s3976_s11 + $0x1] ss:$0 sm:$0xff] }
 0xdc7   : > { %v1812_v10 = vmul.f32 1.442695, %v1811_v9 }
 0xdc9   : > { %3363 = vpow2.f32 %v1812_v10 }
 0xdd3   : > { %v3364_v11 = vpop.eup %3363 }
 0xdd4   : > { %v1814_v12 = vsel %vm642_vm4, %v3364_v11, 0.0 }
 0xdd5   : > { %1815 = vadd.xlane.f32.xlu1 %v1814_v12 }
 0xde6   : > { %1819 = vrot.lane.b32.xlu1 %v3771_v63, %s3402_s24  ;;  %s3993_s24 = smov 72  }
 0xe62   : > { %v1816_v13 = vpop.xlane.xlu1 %1815 }
 0xe63   : > { %3365 = vrcp.f32 %v1816_v13 }
 0xe66   : > { %v1820_v14 = vpop.permute.xlu1 %1819 }
 0xe67   : > { %3132 = vmatpush3.msra.mxu1 %v1820_v14 }
 0xe68   : > { %3136 = vmatprep.subr.mxu1 %v3393_v7 }
 0xe6d   : > { %v3366_v15 = vpop.eup %3365 }
 0xe6e   : > { %v1818_v17 = vmul.f32 %v3366_v15, %v3364_v11 }
 0xe70   : > { %3134 = vmatmul.mubr.msk.f32.vlgmr.msra.gmra.mrb[20].mxu1 %vm642_vm4, %v1818_v17 }
 0xe71   : > { %3137 = vmatpush3.xpose.msk.msra.mxu1 %vm642_vm4, %v1899_v16  ;;  %3138 = vmatprep.mubr.msk.f32.mxu1 %vm3394_vm0, %v3393_v7  ;;  %v2849_v16 = vld [vmem:[%s3970_s5 + $0x1] ss:$0 sm:$0xff] }
 0xe72   : > { %3141 = vmatprep.subr.mxu1 %v3393_v7 }
 0xe74   : > { %3139 = vmatmul.mubr.msk.f32.vlgmr.msra.gmra.mrb[22].mxu1 %vm642_vm4, %v1897_v18 }
 0xe75   : > { %3143 = vmatprep.mubr.msk.f32.mxu1 %vm3394_vm0, %v3393_v7 }
 0xf43   : > { %v1891_v19 = vpop.f32.mrb[20].mxu1 }
 0xf44   : > { %1895 = vst.msk [vmem:[#allocation2] sm:$0xff] %vm642_vm4, %v1891_v19  ;;  %v3135_v20 = vpop.f32.mrb[21].mxu1 }
 0xf47   : > { %v1970_v21 = vpop.f32.mrb[22].mxu1 }
 0xf48   : > { %v3140_v22 = vpop.f32.mrb[23].mxu1  ;;  %v1974_v23 = vsel %vm642_vm4, %v1970_v21, -inf }
 0xf49   : > { %1975 = vmax.xlane.f32.xlu1 %v1974_v23 }
 0xf5a   : > { %2068 = vrot.lane.b32.xlu1 %v3771_v63, %s3397_s18  ;;  %s3994_s18 = smov 48  }
 0xf5e   : > { %2066 = vrot.lane.b32.xlu1 %v1729_v1, %s3990_s16 }
 0xf62   : > { %2236 = vrot.lane.b32.xlu1 %v1729_v1, %s3991_s17  ;;  %s3997_s17 = smov 16  }
 0xfd6   : > { %v1976_v25 = vpop.xlane.xlu1 %1975 }
 0xfd7   : > { %v1977_v26 = vsub.f32 %v1970_v21, %v1976_v25 }
 0xfd9   : > { %v1978_v27 = vmul.f32 1.442695, %v1977_v26 }
 0xfda   : > { %v2069_v30 = vpop.permute.xlu1 %2068 }
 0xfdb   : > { %3367 = vpow2.f32 %v1978_v27 }
 0xfde   : > { %v2067_v33 = vpop.permute.xlu1 %2066 }
 0xfe2   : > { %v2237_v36 = vpop.permute.xlu1 %2236 }
 0xfe5   : > { %v3368_v28 = vpop.eup %3367 }
 0xfe6   : > { %v1980_v29 = vsel %vm642_vm4, %v3368_v28, 0.0 }
 0xfe7   : > { %1981 = vadd.xlane.f32.xlu0 %v1980_v29 }
 0xffd   : > { %1985 = vrot.lane.b32.xlu0 %v3771_v63, %s3992_s19  ;;  %s3998_s19 = smov 24  }
0x1001   : > { %2238 = vrot.lane.b32.xlu0 %v3771_v63, %s3993_s24 }
0x1074   : > { %v1982_v31 = vpop.xlane.xlu0 %1981 }
0x1075   : > { %3369 = vrcp.f32 %v1982_v31 }
0x1078   : > { %v1986_v32 = vpop.permute.xlu0 %1985 }
0x1079   : > { %3142 = vmatpush3.msra.mxu1 %v1986_v32  ;;  %v2862_v32 = vld [vmem:[%s3975_s10 + $0x80] sm:$0xff] }
0x107a   : > { %3146 = vmatprep.subr.mxu1 %v3393_v7 }
0x107c   : > { %v2239_v34 = vpop.permute.xlu0 %2238 }
0x107d   : > { %3157 = vmatpush3.xpose.msk.msra.mxu0 %vm642_vm4, %v2239_v34  ;;  %v2864_v34 = vld [vmem:[%s3975_s10 + $0x90] sm:$0xff] }
0x107e   : > { %3280 = vmatprep.subr.bf16.mxu0 %v3392_v4 }
0x107f   : > { %v3370_v35 = vpop.eup %3369 }
0x1080   : > { %v1984_v37 = vmul.f32 %v3370_v35, %v3368_v28  ;;  %3159 = vmatmul.mubr.msk.f32.vlgmr.msra.gmra.mrb[10].mxu0 %vm642_vm4, %v2237_v36  ;;  %v2856_v28 = vld [vmem:[%s3973_s8 + $0x28] sm:$0xff]  ;;  %v2865_v36 = vld [vmem:[%s3975_s10 + $0x98] sm:$0xff] }
0x1081   : > { %3174 = vmatprep.mubr.msk.f32.mxu0 %vm3394_vm0, %v3393_v7 }
0x1082   : > { %3144 = vmatmul.mubr.msk.f32.vlgmr.msra.gmra.mrb[24].mxu1 %vm642_vm4, %v1984_v37  ;;  %v3296_v37 = vpack.c.bf16 %v2865_v36, %v2864_v34 }
0x1083   : > { %3147 = vmatpush3.xpose.msk.msra.mxu1 %vm642_vm4, %v2069_v30  ;;  %3148 = vmatprep.mubr.msk.f32.mxu1 %vm3394_vm0, %v3393_v7  ;;  %v2858_v30 = vld [vmem:[%s3973_s8 + $0x38] sm:$0xff] }
0x1084   : > { %3151 = vmatprep.subr.mxu1 %v3393_v7 }
0x1086   : > { %3149 = vmatmul.mubr.msk.f32.vlgmr.msra.gmra.mrb[26].mxu1 %vm642_vm4, %v2067_v33  ;;  %v2863_v33 = vld [vmem:[%s3975_s10 + $0x88] sm:$0xff] }
0x1087   : > { %3153 = vmatprep.mubr.msk.f32.mxu1 %vm3394_vm0, %v3393_v7  ;;  %v3293_v35 = vpack.c.bf16 %v2863_v33, %v2862_v32 }
0x1153   : > { %v2310_v38 = vpop.f32.mrb[10].mxu0 }
0x1154   : > { %v3160_v39 = vpop.f32.mrb[11].mxu0  ;;  %v2314_v40 = vsel %vm642_vm4, %v2310_v38, -inf }
0x1155   : > { %2315 = vmax.xlane.f32.xlu1 %v2314_v40  ;;  %v2057_v41 = vpop.f32.mrb[24].mxu1  ;;  %v2867_v39 = vld [vmem:[%s3975_s10 + $0xa8] sm:$0xff] }
0x1156   : > { %v3145_v42 = vpop.f32.mrb[25].mxu1 }
0x1157   : > { %v2869_v42 = vld [vmem:[%s3975_s10 + $0xb8] sm:$0xff] }
0x1159   : > { %v2140_v43 = vpop.f32.mrb[26].mxu1 }
0x115a   : > { %v3150_v44 = vpop.f32.mrb[27].mxu1  ;;  %v2144_v45 = vsel %vm642_vm4, %v2140_v43, -inf }
0x115b   : > { %2145 = vmax.xlane.f32.xlu0 %v2144_v45  ;;  %v2870_v44 = vld [vmem:[%s3975_s10 + $0xc0] sm:$0xff]  ;;  %v2871_v45 = vld [vmem:[%s3975_s10 + $0xc8] sm:$0xff] }
0x1166   : > { %2155 = vrot.lane.b32.xlu1 %v3771_v63, %s3994_s18 }
0x116a   : > { %2062 = vrot.lane.b32.xlu1 %v2057_v41, %s3995_s27  ;;  %v2868_v41 = vld [vmem:[%s3975_s10 + $0xb0] sm:$0xff] }
0x11e2   : > { %v2316_v46 = vpop.xlane.xlu1 %2315 }
0x11e3   : > { %v2317_v47 = vsub.f32 %v2310_v38, %v2316_v46  ;;  %v2866_v38 = vld [vmem:[%s3975_s10 + $0xa0] sm:$0xff]  ;;  %v3305_v46 = vpack.c.bf16 %v2871_v45, %v2870_v44 }
0x11e4   : > { %v3299_v40 = vpack.c.bf16 %v2867_v39, %v2866_v38 }
0x11e5   : > { %v2318_v48 = vmul.f32 1.442695, %v2317_v47  ;;  %v2872_v47 = vld [vmem:[%s3975_s10 + $0xd0] sm:$0xff] }
0x11e6   : > { %v2156_v49 = vpop.permute.xlu1 %2155 }
0x11e7   : > { %3371 = vpow2.f32 %v2318_v48  ;;  %3152 = vmatpush3.msra.mxu1 %v2156_v49  ;;  %v2873_v48 = vld [vmem:[%s3975_s10 + $0xd8] sm:$0xff] }
0x11e8   : > { %v2146_v50 = vpop.xlane.xlu0 %2145  ;;  %3161 = vmatprep.subr.mxu1 %v3393_v7  ;;  %v3308_v49 = vpack.c.bf16 %v2873_v48, %v2872_v47 }
0x11e9   : > { %v2147_v51 = vsub.f32 %v2140_v43, %v2146_v50  ;;  %v3302_v43 = vpack.c.bf16 %v2869_v42, %v2868_v41  ;;  %v2874_v50 = vld [vmem:[%s3975_s10 + $0xe0] sm:$0xff] }
0x11ea   : > { %v2063_v52 = vpop.permute.xlu1 %2062 }
0x11eb   : > { %v2148_v53 = vmul.f32 1.442695, %v2147_v51  ;;  %2065 = vst.msk [vmem:[#allocation2] sm:$0xff] %vm975_vm5, %v2063_v52  ;;  %v2875_v51 = vld [vmem:[%s3975_s10 + $0xe8] sm:$0xff] }
0x11ec   : > { %v3311_v52 = vpack.c.bf16 %v2875_v51, %v2874_v50 }
0x11ed   : > { %3373 = vpow2.f32 %v2148_v53 }
0x11f1   : > { %v3372_v54 = vpop.eup %3371 }
0x11f2   : > { %v2320_v55 = vsel %vm642_vm4, %v3372_v54, 0.0 }
0x11f3   : > { %2321 = vadd.xlane.f32.xlu0 %v2320_v55 }
0x11f7   : > { %v3374_v56 = vpop.eup %3373 }
0x11f8   : > { %v2150_v24 = vsel %vm642_vm4, %v3374_v56, 0.0 }
0x11f9   : > { %2151 = vadd.xlane.f32.xlu0 %v2150_v24  ;;  %v2853_v24 = vld [vmem:[%s3971_s6 + $0x1] ss:$0 sm:$0xff] }
0x120f   : > { %2325 = vrot.lane.b32.xlu0 %v3771_v63, %s3996_s28  ;;  %v2844_v63 = vld [vmem:[%s3969_s4 + $0x20] sm:$0xff] }
0x1210   : > { %v3281_v3 = vpack.c.bf16 %v2845_v2, %v2844_v63 }
0x1212   : > { %3282 = vmatpush3.bf16.msra.mxu0 %v3281_v3 }
0x1213   : > { %3283 = vmatprep.subr.bf16.mxu0 %v3392_v4 }
0x1216   : > { %3285 = vmatpush3.bf16.msra.mxu0 %v3284_v8 }
0x1217   : > { %3292 = vmatprep.subr.bf16.mxu0 %v3392_v4 }
0x1280   : > { %v2322_v57 = vpop.xlane.xlu0 %2321 }
0x1286   : > { %v2152_v58 = vpop.xlane.xlu0 %2151 }
0x1287   : > { %3375 = vrcp.f32 %v2152_v58  ;;  %v2854_v58 = vld [vmem:[%s3972_s7 + $0x1] ss:$0 sm:$0xff] }
0x1288   : > { %3377 = vrcp.f32 %v2322_v57 }
0x128a   : > { %v2326_v0 = vpop.permute.xlu0 %2325 }
0x1291   : > { %v3376_v59 = vpop.eup %3375 }
0x1292   : > { %v2154_v61 = vmul.f32 %v3376_v59, %v3374_v56  ;;  %v3378_v62 = vpop.eup %3377 }
0x1293   : > { %v2324_v1 = vmul.f32 %v3378_v62, %v3372_v54  ;;  %v2877_v62 = vld [vmem:[%s3975_s10 + $0xf8] sm:$0xff] }
0x1294   : > { %3154 = vmatmul.mubr.msk.f32.vlgmr.msra.gmra.mrb[28].mxu1 %vm642_vm4, %v2154_v61 }
0x1295   : > { %3162 = vmatpush3.msra.mxu1 %v2326_v0  ;;  %3163 = vmatprep.mubr.msk.f32.mxu1 %vm3394_vm0, %v3393_v7 }
0x1296   : > { %3286 = vmatprep.subr.bf16.mxu1 %v3392_v4 }
0x1298   : > { %3164 = vmatmul.mubr.msk.f32.vlgmr.msra.gmra.mrb[30].mxu1 %vm642_vm4, %v2324_v1  ;;  %v2860_v1 = vld [vmem:[%s3974_s9 + $0x1] ss:$0 sm:$0xff] }
0x1299   : > { %3185 = vmatprep.mubr.msk.f32.mxu1 %vm3394_vm0, %v3393_v7 }
0x1367   : > { %v2227_v9 = vpop.f32.mrb[28].mxu1 }
0x1368   : > { %2232 = vrot.lane.b32.xlu1 %v2227_v9, %s3997_s17  ;;  %v3155_v10 = vpop.f32.mrb[29].mxu1  ;;  %s3999_s17 = sshll.u32 %s4001_s30, 3 }
0x1369   : > { %s462_s18 = scalar_lea.vmem %s3979_s14, %s3999_s17 }
0x136b   : > { %v2397_v11 = vpop.f32.mrb[30].mxu1 }
0x136c   : > { %2402 = vrot.lane.b32.xlu0 %v2397_v11, %s3998_s19  ;;  %v3165_v12 = vpop.f32.mrb[31].mxu1 }
0x13da   : > { %v2233_v13 = vpop.permute.xlu1 %2232 }
0x13db   : > { %2235 = vst.msk [vmem:[#allocation2] sm:$0xff] %vm1146_vm6, %v2233_v13 }
0x13de   : > { %v2403_v14 = vpop.permute.xlu0 %2402 }
0x13df   : > { %2405 = vst.msk [vmem:[#allocation2] sm:$0xff] %vm1317_vm7, %v2403_v14 }
0x13e6   : > { %v2406_v15 = vld [vmem:[#allocation2] sm:$0xff] }
0x13e7   : > { %3175 = vmatmul.mubr.msk.f32.vlgmr.msra.gmra.mrb[12].mxu0 %vm564_vm3, %v2406_v15 }
0x13e8   : > { %3220 = vmatprep.mubr.msk.f32.mxu0 %vm3394_vm0, %v3393_v7  ;;  %v2855_v7 = vld [vmem:[%s3973_s8 + $0x20] sm:$0xff]  ;;  %3294 = vmatpush3.bf16.msra.mxu0 %v3293_v35 }
0x13e9   : > { %v3287_v29 = vpack.c.bf16 %v2856_v28, %v2855_v7  ;;  %3295 = vmatprep.subr.bf16.mxu0 %v3392_v4 }
0x13eb   : > { %3288 = vmatpush3.bf16.msra.mxu1 %v3287_v29 }
0x13ec   : > { %3289 = vmatprep.subr.bf16.mxu1 %v3392_v4  ;;  %3297 = vmatpush3.bf16.msra.mxu0 %v3296_v37 }
0x13ed   : > { %3298 = vmatprep.subr.bf16.mxu0 %v3392_v4 }
0x13f0   : > { %3300 = vmatpush3.bf16.msra.mxu0 %v3299_v40 }
0x13f1   : > { %3301 = vmatprep.subr.bf16.mxu0 %v3392_v4 }
0x13f4   : > { %3303 = vmatpush3.bf16.msra.mxu0 %v3302_v43 }
0x13f5   : > { %3304 = vmatprep.subr.bf16.mxu0 %v3392_v4 }
0x13f8   : > { %3306 = vmatpush3.bf16.msra.mxu0 %v3305_v46 }
0x13f9   : > { %3307 = vmatprep.subr.bf16.mxu0 %v3392_v4 }
0x13fc   : > { %3309 = vmatpush3.bf16.msra.mxu0 %v3308_v49 }
0x13fd   : > { %3310 = vmatprep.subr.bf16.mxu0 %v3392_v4 }
0x1400   : > { %3312 = vmatpush3.bf16.msra.mxu0 %v3311_v52 }
0x1401   : > { %3313 = vmatprep.subr.bf16.mxu0 %v3392_v4  ;;  %v2876_v4 = vld [vmem:[%s3975_s10 + $0xf0] sm:$0xff] }
0x1402   : > { %v3314_v0 = vpack.c.bf16 %v2877_v62, %v2876_v4 }
0x1404   : > { %3315 = vmatpush3.bf16.msra.mxu0 %v3314_v0 }
0x14ba   : > { %v2489_v17 = vpop.f32.mrb[12].mxu0 }
0x14bb   : > { %v2490_v18 = vadd.f32 %v2849_v16, %v2489_v17  ;;  %v3176_v19 = vpop.f32.mrb[13].mxu0 }
0x14bd   : > { %v2493_v20 = vadd.f32 %v2490_v18, %v3762_v60  ;;  %v2857_v60 = vld [vmem:[%s3973_s8 + $0x30] sm:$0xff] }
0x14be   : > { %v3290_v31 = vpack.c.bf16 %v2858_v30, %v2857_v60 }
0x14bf   : > { %v2498_v21 = vsel %vm564_vm3, %v2493_v20, 0.0 }
0x14c0   : > { %2499 = vadd.xlane.f32.xlu1 %v2498_v21  ;;  %3291 = vmatpush3.bf16.msra.mxu1 %v3290_v31 }
0x154d   : > { %v2500_v22 = vpop.xlane.xlu1 %2499 }
0x154e   : > { %v2501_v23 = vmul.f32 0.03125, %v2500_v22  ;;  %v2882_v22 = vld [vmem:[%s3977_s12 + $0x1] ss:$0 sm:$0xff] }
0x1550   : > { %v2502_v25 = vsub.f32 %v2493_v20, %v2501_v23 }
0x1552   : > { %v2503_v26 = vmul.f32 %v2502_v25, %v2502_v25 }
0x1554   : > { %v2504_v27 = vsel %vm564_vm3, %v2503_v26, 0.0 }
0x1555   : > { %2505 = vadd.xlane.f32.xlu0 %v2504_v27 }
0x15e2   : > { %v2506_v53 = vpop.xlane.xlu0 %2505 }
0x15e3   : > { %v2507_v54 = vmul.f32 0.03125, %v2506_v53 }
0x15e5   : > { %v2508_v55 = vadd.f32 1e-05, %v2507_v54 }
0x15e7   : > { %3379 = vrsqrt.f32 %v2508_v55 }
0x15f1   : > { %v3380_v56 = vpop.eup %3379 }
0x15f2   : > { %v2510_v57 = vmul.f32 %v3380_v56, %v2502_v25  ;;  %v2883_v25 = vld [vmem:[%s3978_s13 + $0x1] ss:$0 sm:$0xff] }
0x15f4   : > { %v2517_v59 = vmul.f32 %v2853_v24, %v2510_v57 }
0x15f6   : > { %v2524_v61 = vadd.f32 %v2854_v58, %v2517_v59 }
0x15f8   : > { %3186 = vmatmul.mubr.msk.f32.vlgmr.msra.gmra.mrb[32].mxu1 %vm564_vm3, %v2524_v61 }
0x16cb   : > { %v2607_v63 = vpop.f32.mrb[32].mxu1 }
0x16cc   : > { %v2608_v2 = vadd.f32 %v2860_v1, %v2607_v63  ;;  %v3187_v3 = vpop.f32.mrb[33].mxu1 }
0x16ce   : > { %v2611_v5 = vmax.f32 %v2608_v2, 0.0 }
0x16d0   : > { %3221 = vmatmul.mubr.f32.vlgmr.msra.gmra.mrb[14].mxu0 %v2611_v5 }
0x17a3   : > { %v2703_v8 = vpop.f32.mrb[14].mxu0 }
0x17a4   : > { %v2704_v9 = vadd.f32 %v2879_v6, %v2703_v8  ;;  %v3222_v10 = vpop.f32.mrb[15].mxu0 }
0x17a6   : > { %v2707_v11 = vadd.f32 %v2704_v9, %v2524_v61 }
0x17a8   : > { %v2712_v12 = vsel %vm564_vm3, %v2707_v11, 0.0 }
0x17a9   : > { %2713 = vadd.xlane.f32.xlu0 %v2712_v12 }
0x1836   : > { %v2714_v13 = vpop.xlane.xlu0 %2713 }
0x1837   : > { %v2715_v14 = vmul.f32 0.03125, %v2714_v13 }
0x1839   : > { %v2716_v15 = vsub.f32 %v2707_v11, %v2715_v14 }
0x183b   : > { %v2717_v16 = vmul.f32 %v2716_v15, %v2716_v15 }
0x183d   : > { %v2718_v17 = vsel %vm564_vm3, %v2717_v16, 0.0 }
0x183e   : > { %2719 = vadd.xlane.f32.xlu1 %v2718_v17 }
0x18cb   : > { %v2720_v18 = vpop.xlane.xlu1 %2719 }
0x18cc   : > { %v2721_v19 = vmul.f32 0.03125, %v2720_v18 }
0x18ce   : > { %v2722_v20 = vadd.f32 1e-05, %v2721_v19 }
0x18d0   : > { %3381 = vrsqrt.f32 %v2722_v20 }
0x18da   : > { %v3382_v21 = vpop.eup %3381 }
0x18db   : > { %v2724_v23 = vmul.f32 %v3382_v21, %v2716_v15 }
0x18dd   : > { %v2731_v26 = vmul.f32 %v2882_v22, %v2724_v23 }
0x18df   : > { %v2738_v27 = vadd.f32 %v2883_v25, %v2731_v26 }
0x18e1   : > { %2739 = vst.msk [vmem:[%s462_s18] sm:$0xff] %vm564_vm3, %v2738_v27 }
0x18e2 PF: > { %s24_s29 = sadd.s32 1, %s3389_s29  }
0x18e3   : > { %p21_p4 = scmp.ge.s32.totalorder %s24_s29, 4  }
0x18e5   :  { %23 = sbr.rel (!%p21_p4) target bundleno = 1 (0x1), region = 118 }

</bundles_post_ra>
